<compile_context>
chip_gen: v7x
topology: tpu7x:2x2x1
jax: 0.10.0
libtpu: 0.0.40
codegen_flags: <defaults>
</compile_context>

<pallas_src>
import functools
import math

import jax
import jax.numpy as jnp
import numpy as np
from jax.experimental import pallas as pl
from jax.experimental.pallas import tpu as pltpu

EPS = 1e-6

# Order must match the kernel signature.
PARAM_KEYS = ("ln_g", "ln_b", "wqkv", "bqkv", "wo", "bo", "w1", "b1", "w2", "b2")


# ---------------------------------------------------------------------------
# In-kernel helpers
# ---------------------------------------------------------------------------
def _stats_rstd(x):
  """Row mean and ~1/(std_unbiased + eps) (eps folded inside the rsqrt)."""
  d = x.shape[-1]
  mean = jnp.mean(x, axis=-1, keepdims=True)
  var = jnp.sum((x - mean) ** 2, axis=-1, keepdims=True) * (1.0 / (d - 1))
  return mean, jax.lax.rsqrt(var + EPS)          # EUP rsqrt


def _ln_kernel(x, g, b):
  """Annotated-Transformer LayerNorm."""
  mean, rstd = _stats_rstd(x)
  return g * (x - mean) * rstd + b


def _normalize_kernel(x):
  """Shared (x - mean)/(std + eps); LN affines folded into the FF weights."""
  mean, rstd = _stats_rstd(x)
  return (x - mean) * rstd


# ---------------------------------------------------------------------------
# Fused WorldDecoder kernel: grid = (batch, layer)
# ---------------------------------------------------------------------------
def world_decoder_kernel(x_ref, qa_ref,
                         ln_g_ref, ln_b_ref,
                         wqkv_ref, bqkv_ref, wo_ref, bo_ref,
                         w1_ref, b1_ref, w2_ref, b2_ref,
                         fin_g_ref, fin_b_ref,
                         out_ref,
                         act_ref,
                         *, num_heads):
  """All decoder layers + final LN for one batch element.

  The layer axis is 'arbitrary'; the [x ; qa] activations (T+1, D) stay
  resident in VMEM scratch across layers.  All weight refs cover the FULL
  layer axis (grid-constant blocks, DMA'd once per kernel call) and are
  indexed here with l = pl.program_id(1).
  """
  l = pl.program_id(1)
  n_layers = pl.num_programs(1)
  t = x_ref.shape[1]
  s, d = act_ref.shape
  dh = d // num_heads
  scale = 1.0 / math.sqrt(dh)
  bf16 = jnp.bfloat16
  f32 = jnp.float32

  # -- stage [x ; qa] into the resident activation buffer on the first layer.
  #    Row order [x ; qa] instead of torch's [qa ; x]: attention here is fully
  #    bidirectional and unmasked, hence permutation-equivariant over rows, so
  #    per-row results are identical and the x slab stays sublane-aligned at
  #    row 0.  (If grounding_mask were ever wired in, this would need care.)
  #    The qa row is written once and never updated: torch discards the
  #    per-layer updated qa and reuses the original one at every layer.
  @pl.when(l == 0)
  def _():
    act_ref[0:t, :] = x_ref[0]
    act_ref[t:s, :] = qa_ref[0]

  q = act_ref[...]                                              # (S, D) f32

  # -- self-attention sublayer: q + MHA(LN(q))   (pre-LN, dropout = identity)
  nq = _ln_kernel(q, ln_g_ref[l], ln_b_ref[l]).astype(bf16)     # (S, D)

  # Fused, lane-dense QKV projection: one (S, D) x (D, 3D) MXU matmul.
  qkv = jnp.dot(nq, wqkv_ref[l], preferred_element_type=f32) + bqkv_ref[l]

  # Per-head scores / context on tiny (S, dh) slices of the fused result.
  ctx_parts = []
  for h in range(num_heads):                                    # unrolled
    lo = h * dh
    qh = qkv[:, lo:lo + dh].astype(bf16)
    kh = qkv[:, d + lo:d + lo + dh].astype(bf16)
    vh = qkv[:, 2 * d + lo:2 * d + lo + dh].astype(bf16)
    sc = jax.lax.dot_general(                                   # (S, S)
        qh, kh, (((1,), (1,)), ((), ())),
        preferred_element_type=f32) * scale
    sc = sc - jnp.max(sc, axis=-1, keepdims=True)
    p = jnp.exp(sc)
    p = p * pl.reciprocal(jnp.sum(p, axis=-1, keepdims=True), approx=True)
    ctx_parts.append(jnp.dot(p.astype(bf16), vh,
                             preferred_element_type=f32))       # (S, dh)
  ctx = jnp.concatenate(ctx_parts, axis=-1).astype(bf16)        # (S, D)

  # One lane-dense output projection instead of H per-head accumulations.
  attn = jnp.dot(ctx, wo_ref[l], preferred_element_type=f32) + bo_ref[l]

  # Residual; only the x rows of the attention output are used downstream
  # (torch discards the updated qa row).
  x_mid = q[0:t, :] + attn[0:t, :]                              # (T, D)

  # -- fused feed-forward sublayers (own + external), summed.
  z = _normalize_kernel(x_mid)             # shared LN stats for both branches
  hid = jnp.maximum(
      jnp.dot(z.astype(bf16), w1_ref[l], preferred_element_type=f32)
      + b1_ref[l], 0.0)                                         # (T, 2F)
  ff = jnp.dot(hid.astype(bf16), w2_ref[l],
               preferred_element_type=f32) + b2_ref[l]          # (T, D)
  x_new = 2.0 * x_mid + ff                  # == y_own + y_ext (detach = fwd id)

  # carry x to the next layer (qa row stays the original qa)
  act_ref[0:t, :] = x_new

  # -- last layer: fold in the final LayerNorm and emit the output
  @pl.when(l == n_layers - 1)
  def _():
    out_ref[0] = _ln_kernel(x_new, fin_g_ref[...],
                            fin_b_ref[...]).astype(out_ref.dtype)


# ---------------------------------------------------------------------------
# Parameter repacking (wrapper-side, done once per call)
# ---------------------------------------------------------------------------
def _prepare_params(params):
  """Repack torch-layout params into the kernel layout.

  * Q/K/V weights packed column-wise into one (D, 3D) matrix (lane-dense MXU
    matmul); the output projection stays the original (D, D) wo.
  * The two FF up-projections get their LayerNorm affines folded in and are
    packed into one (D, 2F) matmul; down-projections packed into (2F, D).
  * Matmul weights stored as bf16 (MXU-native, half the weight DMA);
    biases / LN params stay f32.
  All per-layer tensors get a leading L axis; their BlockSpecs cover the full
  L axis so they are DMA'd once per kernel call.
  """
  layers = params["layers"]
  bf16 = jnp.bfloat16
  f32 = jnp.float32
  hi = jax.lax.Precision.HIGHEST

  acc = {k: [] for k in PARAM_KEYS}
  for lp in layers:
    wqkv = jnp.concatenate([lp["wq"], lp["wk"], lp["wv"]], axis=1)  # (D, 3D)
    bqkv = jnp.concatenate([lp["bq"], lp["bk"], lp["bv"]], axis=1)  # (1, 3D)
    # fold FF LN affines (gain scales input rows, bias becomes extra bias term)
    w1o = lp["ln_fo_g"].reshape(-1, 1) * lp["w1o"]
    b1o = jnp.dot(lp["ln_fo_b"], lp["w1o"], precision=hi) + lp["b1o"]
    w1e = lp["ln_fe_g"].reshape(-1, 1) * lp["w1e"]
    b1e = jnp.dot(lp["ln_fe_b"], lp["w1e"], precision=hi) + lp["b1e"]
    vals = dict(
        ln_g=lp["ln_s_g"].astype(f32), ln_b=lp["ln_s_b"].astype(f32),
        wqkv=wqkv.astype(bf16), bqkv=bqkv.astype(f32),
        wo=lp["wo"].astype(bf16), bo=lp["bo"].astype(f32),
        w1=jnp.concatenate([w1o, w1e], axis=1).astype(bf16),        # (D, 2F)
        b1=jnp.concatenate([b1o, b1e], axis=1).astype(f32),         # (1, 2F)
        w2=jnp.concatenate([lp["w2o"], lp["w2e"]], axis=0).astype(bf16),
        b2=(lp["b2o"] + lp["b2e"]).astype(f32),                     # (1, D)
    )
    for k in PARAM_KEYS:
      acc[k].append(vals[k])
  return {k: jnp.stack(v, axis=0) for k, v in acc.items()}      # leading L axis


# ---------------------------------------------------------------------------
# Wrapper
# ---------------------------------------------------------------------------
def world_decoder_forward(x, qa, grounding_mask, params, *, num_heads):
  """Pallas forward for WorldDecoder.

  grounding_mask is accepted but unused, exactly like the torch forward path.
  """
  del grounding_mask
  bsz, t, d = x.shape
  n_layers = len(params["layers"])
  s = t + 1
  prep = _prepare_params(params)

  def bspec(blk):     # per-batch block (re-fetched only when bi changes)
    nd = len(blk)
    return pl.BlockSpec(blk, lambda bi, li, nd=nd: (bi,) + (0,) * (nd - 1))

  def cspec(shape):   # grid-constant: full-array block, DMA'd once per call
    nd = len(shape)
    return pl.BlockSpec(tuple(shape), lambda bi, li, nd=nd: (0,) * nd)

  args = [x, qa]
  in_specs = [bspec((1, t, d)), bspec((1, 1, d))]
  for k in PARAM_KEYS:
    a = prep[k]
    args.append(a)
    in_specs.append(cspec(a.shape))
  args += [params["norm_g"], params["norm_b"]]
  in_specs += [cspec(params["norm_g"].shape), cspec(params["norm_b"].shape)]

  # VMEM budget from actual residency:
  #   constant slabs (weights, norm params): counted x2 (conservatively assume
  #   the pipeline still allocates two buffers even though the block index
  #   never changes), streamed x/qa/out blocks x2 (double-buffered), scratch x1.
  # Cap at 80% of queried VMEM capacity (never the full 64 MiB on v7x).
  def nbytes(a):
    return int(np.prod(a.shape)) * jnp.dtype(a.dtype).itemsize
  const_bytes = (sum(nbytes(prep[k]) for k in PARAM_KEYS)
                 + nbytes(params["norm_g"]) + nbytes(params["norm_b"]))
  stream_bytes = (nbytes(x) // bsz + nbytes(qa) // bsz
                  + t * d * jnp.dtype(x.dtype).itemsize)
  needed = 2 * const_bytes + 2 * stream_bytes + s * d * 4 + (2 << 20)
  cap = 64 * 1024 * 1024
  try:
    cap = int(getattr(pltpu.get_tpu_info(), "vmem_capacity_bytes", cap))
  except Exception:
    pass
  allowed = max(32 * 1024 * 1024, int(cap * 0.8))
  vmem_limit = int(min(max(needed, 32 * 1024 * 1024), allowed))

  return pl.pallas_call(
      functools.partial(world_decoder_kernel, num_heads=num_heads),
      grid=(bsz, n_layers),
      in_specs=in_specs,
      out_specs=pl.BlockSpec((1, t, d), lambda bi, li: (bi, 0, 0)),
      out_shape=jax.ShapeDtypeStruct((bsz, t, d), x.dtype),
      scratch_shapes=[pltpu.VMEM((s, d), jnp.float32)],
      compiler_params=pltpu.CompilerParams(
          dimension_semantics=("parallel", "arbitrary"),
          vmem_limit_bytes=vmem_limit),
  )(*args)


# ---------------------------------------------------------------------------
# Deterministic synthetic parameters + pure-JAX reference (torch structure)
# ---------------------------------------------------------------------------
def init_params(key, embed_dim, ff_dim, num_layer):
  def lin(k, din, dout, scl):
    kw, kb = jax.random.split(k)
    return (scl * jax.random.normal(kw, (din, dout), jnp.float32),
            0.01 * jax.random.normal(kb, (1, dout), jnp.float32))

  def ln(k, dim):
    kg, kb = jax.random.split(k)
    return (1.0 + 0.1 * jax.random.normal(kg, (1, dim), jnp.float32),
            0.05 * jax.random.normal(kb, (1, dim), jnp.float32))

  layers = []
  for kl in jax.random.split(key, num_layer):
    ks = jax.random.split(kl, 11)
    wq, bq = lin(ks[0], embed_dim, embed_dim, embed_dim ** -0.5)
    wk, bk = lin(ks[1], embed_dim, embed_dim, embed_dim ** -0.5)
    wv, bv = lin(ks[2], embed_dim, embed_dim, embed_dim ** -0.5)
    wo, bo = lin(ks[3], embed_dim, embed_dim, embed_dim ** -0.5)
    w1o, b1o = lin(ks[4], embed_dim, ff_dim, embed_dim ** -0.5)
    w2o, b2o = lin(ks[5], ff_dim, embed_dim, ff_dim ** -0.5)
    w1e, b1e = lin(ks[6], embed_dim, ff_dim, embed_dim ** -0.5)
    w2e, b2e = lin(ks[7], ff_dim, embed_dim, ff_dim ** -0.5)
    ln_s_g, ln_s_b = ln(ks[8], embed_dim)
    ln_fo_g, ln_fo_b = ln(ks[9], embed_dim)
    ln_fe_g, ln_fe_b = ln(ks[10], embed_dim)
    layers.append(dict(
        ln_s_g=ln_s_g, ln_s_b=ln_s_b,
        wq=wq, bq=bq, wk=wk, bk=bk, wv=wv, bv=bv, wo=wo, bo=bo,
        ln_fo_g=ln_fo_g, ln_fo_b=ln_fo_b, w1o=w1o, b1o=b1o, w2o=w2o, b2o=b2o,
        ln_fe_g=ln_fe_g, ln_fe_b=ln_fe_b, w1e=w1e, b1e=b1e, w2e=w2e, b2e=b2e,
    ))
  norm_g, norm_b = ln(jax.random.fold_in(key, 7), embed_dim)
  return dict(layers=layers, norm_g=norm_g, norm_b=norm_b)


def _mm_ref(a, w):
  """Reference matmul with the kernel's numerics policy (bf16 in, f32 acc)."""
  return jnp.dot(a.astype(jnp.bfloat16), w.astype(jnp.bfloat16),
                 preferred_element_type=jnp.float32)


def _ln_ref(x, g, b):
  d = x.shape[-1]
  mean = jnp.mean(x, axis=-1, keepdims=True)
  var = jnp.sum((x - mean) ** 2, axis=-1, keepdims=True) / (d - 1)
  return g * (x - mean) / (jnp.sqrt(var) + EPS) + b


def _mha_ref(nq, lp, num_heads):
  s, d = nq.shape
  dh = d // num_heads
  q = (_mm_ref(nq, lp["wq"]) + lp["bq"]).reshape(s, num_heads, dh)
  k = (_mm_ref(nq, lp["wk"]) + lp["bk"]).reshape(s, num_heads, dh)
  v = (_mm_ref(nq, lp["wv"]) + lp["bv"]).reshape(s, num_heads, dh)
  scores = jnp.einsum("shd,thd->hst", q.astype(jnp.bfloat16),
                      k.astype(jnp.bfloat16),
                      preferred_element_type=jnp.float32) / math.sqrt(dh)
  p = jax.nn.softmax(scores, axis=-1)
  ctx = jnp.einsum("hst,thd->shd", p.astype(jnp.bfloat16),
                   v.astype(jnp.bfloat16),
                   preferred_element_type=jnp.float32).reshape(s, d)
  return _mm_ref(ctx, lp["wo"]) + lp["bo"]


def _ff_ref(x, g, b, w1, b1, w2, b2):
  n = _ln_ref(x, g, b)
  h = jnp.maximum(_mm_ref(n, w1) + b1, 0.0)
  return x + _mm_ref(h, w2) + b2


def world_decoder_reference(x, qa, params, *, num_heads):
  """Pure-JAX reference mirroring the torch forward structure (eval mode).

  Note: as in torch, the updated qa returned by each DecoderLayer is discarded;
  every layer concatenates the ORIGINAL qa with the current x.
  """
  outs = []
  for i in range(x.shape[0]):
    xb, qb = x[i], qa[i]                               # qb stays the original
    for lp in params["layers"]:
      q = jnp.concatenate([qb, xb], axis=0)            # torch order [qa ; x]
      q = q + _mha_ref(_ln_ref(q, lp["ln_s_g"], lp["ln_s_b"]), lp, num_heads)
      xb = q[1:]
      xb = (_ff_ref(xb, lp["ln_fo_g"], lp["ln_fo_b"],
                    lp["w1o"], lp["b1o"], lp["w2o"], lp["b2o"])
            + _ff_ref(xb, lp["ln_fe_g"], lp["ln_fe_b"],
                      lp["w1e"], lp["b1e"], lp["w2e"], lp["b2e"]))
    outs.append(_ln_ref(xb, params["norm_g"], params["norm_b"]))
  return jnp.stack(outs, axis=0)


# TODO(synk): neg_sample/_sample_negatives use host-side Python RNG over the
# batch; they are not part of forward() and are not implemented here.

if __name__ == "__main__":
  # Small shapes consistent with the module (real module: D = F = 768, H = 8,
  # L = 2).  D = 128 keeps the lane axis dense; B = 2 keeps both v7x cores busy.
  B, T, D, H, F, L = 2, 8, 128, 8, 128, 2
  key = jax.random.PRNGKey(0)
  kx, kq, kp = jax.random.split(key, 3)
  x = jax.random.normal(kx, (B, T, D), jnp.float32)
  qa = jax.random.normal(kq, (B, 1, D), jnp.float32)
  grounding_mask = jnp.ones((B, T), jnp.bool_)          # unused by forward()
  params = init_params(kp, D, F, L)

  fwd = jax.jit(functools.partial(world_decoder_forward, num_heads=H))
  out = jax.block_until_ready(fwd(x, qa, grounding_mask, params))

  ref = world_decoder_reference(x, qa, params, num_heads=H)
  # Both paths run matmuls with bf16 operands / f32 accumulation (MXU-native);
  # remaining differences come from re-associations (QKV/FF packing, LN-affine
  # folding, rsqrt / approx-reciprocal), hence the loosened tolerance.
  np.testing.assert_allclose(np.asarray(out), np.asarray(ref),
                             atol=3e-2, rtol=3e-2)
  print("KERNEL_OK")
</pallas_src>

<mosaic_0001>
module attributes {stable_mosaic.version = 11 : i64} {
  func.func @world_decoder_kernel(%arg0: i32, %arg1: i32, %arg2: memref<1x8x128xf32, #tpu.memory_space<vmem>>, %arg3: memref<1x1x128xf32, #tpu.memory_space<vmem>>, %arg4: memref<2x1x128xf32, #tpu.memory_space<vmem>>, %arg5: memref<2x1x128xf32, #tpu.memory_space<vmem>>, %arg6: memref<2x128x384xbf16, #tpu.memory_space<vmem>>, %arg7: memref<2x1x384xf32, #tpu.memory_space<vmem>>, %arg8: memref<2x128x128xbf16, #tpu.memory_space<vmem>>, %arg9: memref<2x1x128xf32, #tpu.memory_space<vmem>>, %arg10: memref<2x128x256xbf16, #tpu.memory_space<vmem>>, %arg11: memref<2x1x256xf32, #tpu.memory_space<vmem>>, %arg12: memref<2x256x128xbf16, #tpu.memory_space<vmem>>, %arg13: memref<2x1x128xf32, #tpu.memory_space<vmem>>, %arg14: memref<1x128xf32, #tpu.memory_space<vmem>>, %arg15: memref<1x128xf32, #tpu.memory_space<vmem>>, %arg16: memref<1x8x128xf32, #tpu.memory_space<vmem>>, %arg17: memref<9x128xf32, #tpu.memory_space<vmem>>) attributes {dimension_semantics = [#tpu.dimension_semantics<parallel>, #tpu.dimension_semantics<arbitrary>], iteration_bounds = array<i64: 2, 2>, scalar_prefetch = 0 : i64, scratch_operands = 1 : i64, tpu.core_type = #tpu.core_type<tc>, window_params = [{transform_indices = @transform_0, window_bounds = array<i64: 1, 8, 128>}, {transform_indices = @transform_1, window_bounds = array<i64: 1, 1, 128>}, {pipeline_mode = #tpu.pipeline_mode<synchronous>, transform_indices = @transform_2, window_bounds = array<i64: 2, 1, 128>}, {pipeline_mode = #tpu.pipeline_mode<synchronous>, transform_indices = @transform_3, window_bounds = array<i64: 2, 1, 128>}, {pipeline_mode = #tpu.pipeline_mode<synchronous>, transform_indices = @transform_4, window_bounds = array<i64: 2, 128, 384>}, {pipeline_mode = #tpu.pipeline_mode<synchronous>, transform_indices = @transform_5, window_bounds = array<i64: 2, 1, 384>}, {pipeline_mode = #tpu.pipeline_mode<synchronous>, transform_indices = @transform_6, window_bounds = array<i64: 2, 128, 128>}, {pipeline_mode = #tpu.pipeline_mode<synchronous>, transform_indices = @transform_7, window_bounds = array<i64: 2, 1, 128>}, {pipeline_mode = #tpu.pipeline_mode<synchronous>, transform_indices = @transform_8, window_bounds = array<i64: 2, 128, 256>}, {pipeline_mode = #tpu.pipeline_mode<synchronous>, transform_indices = @transform_9, window_bounds = array<i64: 2, 1, 256>}, {pipeline_mode = #tpu.pipeline_mode<synchronous>, transform_indices = @transform_10, window_bounds = array<i64: 2, 256, 128>}, {pipeline_mode = #tpu.pipeline_mode<synchronous>, transform_indices = @transform_11, window_bounds = array<i64: 2, 1, 128>}, {pipeline_mode = #tpu.pipeline_mode<synchronous>, transform_indices = @transform_12, window_bounds = array<i64: 1, 128>}, {pipeline_mode = #tpu.pipeline_mode<synchronous>, transform_indices = @transform_13, window_bounds = array<i64: 1, 128>}, {transform_indices = @transform_14, window_bounds = array<i64: 1, 8, 128>}]} {
    %c0_i32 = arith.constant 0 : i32
    %0 = arith.cmpi eq, %arg1, %c0_i32 : i32
    %1 = arith.extui %0 : i1 to i32
    %c0_i32_0 = arith.constant 0 : i32
    %2 = arith.cmpi ne, %1, %c0_i32_0 : i32
    scf.if %2 {
      %c0_80 = arith.constant 0 : index
      %c0_81 = arith.constant 0 : index
      %c0_82 = arith.constant 0 : index
      %271 = vector.load %arg2[%c0_80, %c0_81, %c0_82] : memref<1x8x128xf32, #tpu.memory_space<vmem>>, vector<1x8x128xf32>
      %272 = vector.shape_cast %271 : vector<1x8x128xf32> to vector<8x128xf32>
      %c0_83 = arith.constant 0 : index
      %c0_84 = arith.constant 0 : index
      %273 = vector.load %arg17[%c0_83, %c0_84] : memref<9x128xf32, #tpu.memory_space<vmem>>, vector<8x128xf32>
      tpu.vector_store %arg17[%c0_83, %c0_84], %272 {strides = array<i32>} : memref<9x128xf32, #tpu.memory_space<vmem>>, vector<8x128xf32>,
      %c0_85 = arith.constant 0 : index
      %c0_86 = arith.constant 0 : index
      %c0_87 = arith.constant 0 : index
      %274 = vector.load %arg3[%c0_85, %c0_86, %c0_87] : memref<1x1x128xf32, #tpu.memory_space<vmem>>, vector<1x1x128xf32>
      %275 = vector.shape_cast %274 : vector<1x1x128xf32> to vector<1x128xf32>
      %c8 = arith.constant 8 : index
      %c0_88 = arith.constant 0 : index
      %276 = vector.load %arg17[%c8, %c0_88] : memref<9x128xf32, #tpu.memory_space<vmem>>, vector<1x128xf32>
      tpu.vector_store %arg17[%c8, %c0_88], %275 {strides = array<i32>} : memref<9x128xf32, #tpu.memory_space<vmem>>, vector<1x128xf32>,
    } else {
    }
    %c0 = arith.constant 0 : index
    %c0_1 = arith.constant 0 : index
    %3 = vector.load %arg17[%c0, %c0_1] : memref<9x128xf32, #tpu.memory_space<vmem>>, vector<9x128xf32>
    %4 = arith.index_cast %arg1 : i32 to index
    %c0_2 = arith.constant 0 : index
    %c0_3 = arith.constant 0 : index
    %5 = vector.load %arg4[%4, %c0_2, %c0_3] : memref<2x1x128xf32, #tpu.memory_space<vmem>>, vector<1x1x128xf32>
    %6 = vector.shape_cast %5 : vector<1x1x128xf32> to vector<1x128xf32>
    %7 = arith.index_cast %arg1 : i32 to index
    %c0_4 = arith.constant 0 : index
    %c0_5 = arith.constant 0 : index
    %8 = vector.load %arg5[%7, %c0_4, %c0_5] : memref<2x1x128xf32, #tpu.memory_space<vmem>>, vector<1x1x128xf32>
    %9 = vector.shape_cast %8 : vector<1x1x128xf32> to vector<1x128xf32>
    %cst = arith.constant dense<0.000000e+00> : vector<9xf32>
    %10 = vector.multi_reduction <add>, %3, %cst [1] : vector<9x128xf32> to vector<9xf32>
    %11 = vector.shape_cast %10 : vector<9xf32> to vector<9x1xf32>
    %cst_6 = arith.constant 1.280000e+02 : f32
    %12 = vector.broadcast %cst_6 : f32 to vector<9x1xf32>
    %13 = arith.divf %11, %12 : vector<9x1xf32>
    %14 = vector.broadcast %13 : vector<9x1xf32> to vector<9x128xf32>
    %15 = arith.subf %3, %14 : vector<9x128xf32>
    %16 = arith.mulf %15, %15 : vector<9x128xf32>
    %cst_7 = arith.constant dense<0.000000e+00> : vector<9xf32>
    %17 = vector.multi_reduction <add>, %16, %cst_7 [1] : vector<9x128xf32> to vector<9xf32>
    %18 = vector.shape_cast %17 : vector<9xf32> to vector<9x1xf32>
    %cst_8 = arith.constant 0.00787401571 : f32
    %19 = vector.broadcast %cst_8 : f32 to vector<9x1xf32>
    %20 = arith.mulf %18, %19 : vector<9x1xf32>
    %cst_9 = arith.constant 9.99999997E-7 : f32
    %21 = vector.broadcast %cst_9 : f32 to vector<9x1xf32>
    %22 = arith.addf %20, %21 : vector<9x1xf32>
    %23 = math.rsqrt %22 : vector<9x1xf32>
    %24 = vector.broadcast %13 : vector<9x1xf32> to vector<9x128xf32>
    %25 = arith.subf %3, %24 : vector<9x128xf32>
    %26 = vector.broadcast %6 : vector<1x128xf32> to vector<9x128xf32>
    %27 = arith.mulf %26, %25 : vector<9x128xf32>
    %28 = vector.broadcast %23 : vector<9x1xf32> to vector<9x128xf32>
    %29 = arith.mulf %27, %28 : vector<9x128xf32>
    %30 = vector.broadcast %9 : vector<1x128xf32> to vector<9x128xf32>
    %31 = arith.addf %29, %30 : vector<9x128xf32>
    %32 = arith.truncf %31 : vector<9x128xf32> to vector<9x128xbf16>
    %33 = arith.index_cast %arg1 : i32 to index
    %c0_10 = arith.constant 0 : index
    %c0_11 = arith.constant 0 : index
    %34 = vector.load %arg6[%33, %c0_10, %c0_11] : memref<2x128x384xbf16, #tpu.memory_space<vmem>>, vector<1x128x384xbf16>
    %35 = vector.shape_cast %34 : vector<1x128x384xbf16> to vector<128x384xbf16>
    %cst_12 = arith.constant dense<0.000000e+00> : vector<9x384xf32>
    %36 = tpu.matmul %32, %35, %cst_12 {dimension_numbers = #tpu.dot_dimension_numbers<[1], [0], [0], [1], [0, 0, 1, 1], [], []>} : vector<9x128xbf16>, vector<128x384xbf16>, vector<9x384xf32> -> vector<9x384xf32>
    %37 = arith.index_cast %arg1 : i32 to index
    %c0_13 = arith.constant 0 : index
    %c0_14 = arith.constant 0 : index
    %38 = vector.load %arg7[%37, %c0_13, %c0_14] : memref<2x1x384xf32, #tpu.memory_space<vmem>>, vector<1x1x384xf32>
    %39 = vector.shape_cast %38 : vector<1x1x384xf32> to vector<1x384xf32>
    %40 = vector.broadcast %39 : vector<1x384xf32> to vector<9x384xf32>
    %41 = arith.addf %36, %40 : vector<9x384xf32>
    %42 = vector.extract_strided_slice %41 {offsets = [0, 0], sizes = [9, 16], strides = [1, 1]} : vector<9x384xf32> to vector<9x16xf32>
    %43 = arith.truncf %42 : vector<9x16xf32> to vector<9x16xbf16>
    %44 = vector.extract_strided_slice %41 {offsets = [0, 128], sizes = [9, 16], strides = [1, 1]} : vector<9x384xf32> to vector<9x16xf32>
    %45 = arith.truncf %44 : vector<9x16xf32> to vector<9x16xbf16>
    %46 = vector.extract_strided_slice %41 {offsets = [0, 256], sizes = [9, 16], strides = [1, 1]} : vector<9x384xf32> to vector<9x16xf32>
    %47 = arith.truncf %46 : vector<9x16xf32> to vector<9x16xbf16>
    %cst_15 = arith.constant dense<0.000000e+00> : vector<9x9xf32>
    %48 = tpu.matmul %43, %45, %cst_15 {dimension_numbers = #tpu.dot_dimension_numbers<[1], [1], [0], [0], [0, 0, 1, 0], [], []>} : vector<9x16xbf16>, vector<9x16xbf16>, vector<9x9xf32> -> vector<9x9xf32>
    %cst_16 = arith.constant 2.500000e-01 : f32
    %49 = vector.broadcast %cst_16 : f32 to vector<9x9xf32>
    %50 = arith.mulf %48, %49 : vector<9x9xf32>
    %cst_17 = arith.constant dense<0xFF800000> : vector<9xf32>
    %51 = vector.multi_reduction <maximumf>, %50, %cst_17 [1] : vector<9x9xf32> to vector<9xf32>
    %52 = vector.shape_cast %51 : vector<9xf32> to vector<9x1xf32>
    %53 = vector.broadcast %52 : vector<9x1xf32> to vector<9x9xf32>
    %54 = arith.subf %50, %53 : vector<9x9xf32>
    %55 = math.exp %54 : vector<9x9xf32>
    %cst_18 = arith.constant dense<0.000000e+00> : vector<9xf32>
    %56 = vector.multi_reduction <add>, %55, %cst_18 [1] : vector<9x9xf32> to vector<9xf32>
    %57 = vector.shape_cast %56 : vector<9xf32> to vector<9x1xf32>
    %58 = tpu.reciprocal %57 {approx = true} : vector<9x1xf32> -> vector<9x1xf32>
    %59 = vector.broadcast %58 : vector<9x1xf32> to vector<9x9xf32>
    %60 = arith.mulf %55, %59 : vector<9x9xf32>
    %61 = arith.truncf %60 : vector<9x9xf32> to vector<9x9xbf16>
    %cst_19 = arith.constant dense<0.000000e+00> : vector<9x16xf32>
    %62 = tpu.matmul %61, %47, %cst_19 {dimension_numbers = #tpu.dot_dimension_numbers<[1], [0], [0], [1], [0, 0, 1, 1], [], []>} : vector<9x9xbf16>, vector<9x16xbf16>, vector<9x16xf32> -> vector<9x16xf32>
    %63 = vector.extract_strided_slice %41 {offsets = [0, 16], sizes = [9, 16], strides = [1, 1]} : vector<9x384xf32> to vector<9x16xf32>
    %64 = arith.truncf %63 : vector<9x16xf32> to vector<9x16xbf16>
    %65 = vector.extract_strided_slice %41 {offsets = [0, 144], sizes = [9, 16], strides = [1, 1]} : vector<9x384xf32> to vector<9x16xf32>
    %66 = arith.truncf %65 : vector<9x16xf32> to vector<9x16xbf16>
    %67 = vector.extract_strided_slice %41 {offsets = [0, 272], sizes = [9, 16], strides = [1, 1]} : vector<9x384xf32> to vector<9x16xf32>
    %68 = arith.truncf %67 : vector<9x16xf32> to vector<9x16xbf16>
    %cst_20 = arith.constant dense<0.000000e+00> : vector<9x9xf32>
    %69 = tpu.matmul %64, %66, %cst_20 {dimension_numbers = #tpu.dot_dimension_numbers<[1], [1], [0], [0], [0, 0, 1, 0], [], []>} : vector<9x16xbf16>, vector<9x16xbf16>, vector<9x9xf32> -> vector<9x9xf32>
    %cst_21 = arith.constant 2.500000e-01 : f32
    %70 = vector.broadcast %cst_21 : f32 to vector<9x9xf32>
    %71 = arith.mulf %69, %70 : vector<9x9xf32>
    %cst_22 = arith.constant dense<0xFF800000> : vector<9xf32>
    %72 = vector.multi_reduction <maximumf>, %71, %cst_22 [1] : vector<9x9xf32> to vector<9xf32>
    %73 = vector.shape_cast %72 : vector<9xf32> to vector<9x1xf32>
    %74 = vector.broadcast %73 : vector<9x1xf32> to vector<9x9xf32>
    %75 = arith.subf %71, %74 : vector<9x9xf32>
    %76 = math.exp %75 : vector<9x9xf32>
    %cst_23 = arith.constant dense<0.000000e+00> : vector<9xf32>
    %77 = vector.multi_reduction <add>, %76, %cst_23 [1] : vector<9x9xf32> to vector<9xf32>
    %78 = vector.shape_cast %77 : vector<9xf32> to vector<9x1xf32>
    %79 = tpu.reciprocal %78 {approx = true} : vector<9x1xf32> -> vector<9x1xf32>
    %80 = vector.broadcast %79 : vector<9x1xf32> to vector<9x9xf32>
    %81 = arith.mulf %76, %80 : vector<9x9xf32>
    %82 = arith.truncf %81 : vector<9x9xf32> to vector<9x9xbf16>
    %cst_24 = arith.constant dense<0.000000e+00> : vector<9x16xf32>
    %83 = tpu.matmul %82, %68, %cst_24 {dimension_numbers = #tpu.dot_dimension_numbers<[1], [0], [0], [1], [0, 0, 1, 1], [], []>} : vector<9x9xbf16>, vector<9x16xbf16>, vector<9x16xf32> -> vector<9x16xf32>
    %84 = vector.extract_strided_slice %41 {offsets = [0, 32], sizes = [9, 16], strides = [1, 1]} : vector<9x384xf32> to vector<9x16xf32>
    %85 = arith.truncf %84 : vector<9x16xf32> to vector<9x16xbf16>
    %86 = vector.extract_strided_slice %41 {offsets = [0, 160], sizes = [9, 16], strides = [1, 1]} : vector<9x384xf32> to vector<9x16xf32>
    %87 = arith.truncf %86 : vector<9x16xf32> to vector<9x16xbf16>
    %88 = vector.extract_strided_slice %41 {offsets = [0, 288], sizes = [9, 16], strides = [1, 1]} : vector<9x384xf32> to vector<9x16xf32>
    %89 = arith.truncf %88 : vector<9x16xf32> to vector<9x16xbf16>
    %cst_25 = arith.constant dense<0.000000e+00> : vector<9x9xf32>
    %90 = tpu.matmul %85, %87, %cst_25 {dimension_numbers = #tpu.dot_dimension_numbers<[1], [1], [0], [0], [0, 0, 1, 0], [], []>} : vector<9x16xbf16>, vector<9x16xbf16>, vector<9x9xf32> -> vector<9x9xf32>
    %cst_26 = arith.constant 2.500000e-01 : f32
    %91 = vector.broadcast %cst_26 : f32 to vector<9x9xf32>
    %92 = arith.mulf %90, %91 : vector<9x9xf32>
    %cst_27 = arith.constant dense<0xFF800000> : vector<9xf32>
    %93 = vector.multi_reduction <maximumf>, %92, %cst_27 [1] : vector<9x9xf32> to vector<9xf32>
    %94 = vector.shape_cast %93 : vector<9xf32> to vector<9x1xf32>
    %95 = vector.broadcast %94 : vector<9x1xf32> to vector<9x9xf32>
    %96 = arith.subf %92, %95 : vector<9x9xf32>
    %97 = math.exp %96 : vector<9x9xf32>
    %cst_28 = arith.constant dense<0.000000e+00> : vector<9xf32>
    %98 = vector.multi_reduction <add>, %97, %cst_28 [1] : vector<9x9xf32> to vector<9xf32>
    %99 = vector.shape_cast %98 : vector<9xf32> to vector<9x1xf32>
    %100 = tpu.reciprocal %99 {approx = true} : vector<9x1xf32> -> vector<9x1xf32>
    %101 = vector.broadcast %100 : vector<9x1xf32> to vector<9x9xf32>
    %102 = arith.mulf %97, %101 : vector<9x9xf32>
    %103 = arith.truncf %102 : vector<9x9xf32> to vector<9x9xbf16>
    %cst_29 = arith.constant dense<0.000000e+00> : vector<9x16xf32>
    %104 = tpu.matmul %103, %89, %cst_29 {dimension_numbers = #tpu.dot_dimension_numbers<[1], [0], [0], [1], [0, 0, 1, 1], [], []>} : vector<9x9xbf16>, vector<9x16xbf16>, vector<9x16xf32> -> vector<9x16xf32>
    %105 = vector.extract_strided_slice %41 {offsets = [0, 48], sizes = [9, 16], strides = [1, 1]} : vector<9x384xf32> to vector<9x16xf32>
    %106 = arith.truncf %105 : vector<9x16xf32> to vector<9x16xbf16>
    %107 = vector.extract_strided_slice %41 {offsets = [0, 176], sizes = [9, 16], strides = [1, 1]} : vector<9x384xf32> to vector<9x16xf32>
    %108 = arith.truncf %107 : vector<9x16xf32> to vector<9x16xbf16>
    %109 = vector.extract_strided_slice %41 {offsets = [0, 304], sizes = [9, 16], strides = [1, 1]} : vector<9x384xf32> to vector<9x16xf32>
    %110 = arith.truncf %109 : vector<9x16xf32> to vector<9x16xbf16>
    %cst_30 = arith.constant dense<0.000000e+00> : vector<9x9xf32>
    %111 = tpu.matmul %106, %108, %cst_30 {dimension_numbers = #tpu.dot_dimension_numbers<[1], [1], [0], [0], [0, 0, 1, 0], [], []>} : vector<9x16xbf16>, vector<9x16xbf16>, vector<9x9xf32> -> vector<9x9xf32>
    %cst_31 = arith.constant 2.500000e-01 : f32
    %112 = vector.broadcast %cst_31 : f32 to vector<9x9xf32>
    %113 = arith.mulf %111, %112 : vector<9x9xf32>
    %cst_32 = arith.constant dense<0xFF800000> : vector<9xf32>
    %114 = vector.multi_reduction <maximumf>, %113, %cst_32 [1] : vector<9x9xf32> to vector<9xf32>
    %115 = vector.shape_cast %114 : vector<9xf32> to vector<9x1xf32>
    %116 = vector.broadcast %115 : vector<9x1xf32> to vector<9x9xf32>
    %117 = arith.subf %113, %116 : vector<9x9xf32>
    %118 = math.exp %117 : vector<9x9xf32>
    %cst_33 = arith.constant dense<0.000000e+00> : vector<9xf32>
    %119 = vector.multi_reduction <add>, %118, %cst_33 [1] : vector<9x9xf32> to vector<9xf32>
    %120 = vector.shape_cast %119 : vector<9xf32> to vector<9x1xf32>
    %121 = tpu.reciprocal %120 {approx = true} : vector<9x1xf32> -> vector<9x1xf32>
    %122 = vector.broadcast %121 : vector<9x1xf32> to vector<9x9xf32>
    %123 = arith.mulf %118, %122 : vector<9x9xf32>
    %124 = arith.truncf %123 : vector<9x9xf32> to vector<9x9xbf16>
    %cst_34 = arith.constant dense<0.000000e+00> : vector<9x16xf32>
    %125 = tpu.matmul %124, %110, %cst_34 {dimension_numbers = #tpu.dot_dimension_numbers<[1], [0], [0], [1], [0, 0, 1, 1], [], []>} : vector<9x9xbf16>, vector<9x16xbf16>, vector<9x16xf32> -> vector<9x16xf32>
    %126 = vector.extract_strided_slice %41 {offsets = [0, 64], sizes = [9, 16], strides = [1, 1]} : vector<9x384xf32> to vector<9x16xf32>
    %127 = arith.truncf %126 : vector<9x16xf32> to vector<9x16xbf16>
    %128 = vector.extract_strided_slice %41 {offsets = [0, 192], sizes = [9, 16], strides = [1, 1]} : vector<9x384xf32> to vector<9x16xf32>
    %129 = arith.truncf %128 : vector<9x16xf32> to vector<9x16xbf16>
    %130 = vector.extract_strided_slice %41 {offsets = [0, 320], sizes = [9, 16], strides = [1, 1]} : vector<9x384xf32> to vector<9x16xf32>
    %131 = arith.truncf %130 : vector<9x16xf32> to vector<9x16xbf16>
    %cst_35 = arith.constant dense<0.000000e+00> : vector<9x9xf32>
    %132 = tpu.matmul %127, %129, %cst_35 {dimension_numbers = #tpu.dot_dimension_numbers<[1], [1], [0], [0], [0, 0, 1, 0], [], []>} : vector<9x16xbf16>, vector<9x16xbf16>, vector<9x9xf32> -> vector<9x9xf32>
    %cst_36 = arith.constant 2.500000e-01 : f32
    %133 = vector.broadcast %cst_36 : f32 to vector<9x9xf32>
    %134 = arith.mulf %132, %133 : vector<9x9xf32>
    %cst_37 = arith.constant dense<0xFF800000> : vector<9xf32>
    %135 = vector.multi_reduction <maximumf>, %134, %cst_37 [1] : vector<9x9xf32> to vector<9xf32>
    %136 = vector.shape_cast %135 : vector<9xf32> to vector<9x1xf32>
    %137 = vector.broadcast %136 : vector<9x1xf32> to vector<9x9xf32>
    %138 = arith.subf %134, %137 : vector<9x9xf32>
    %139 = math.exp %138 : vector<9x9xf32>
    %cst_38 = arith.constant dense<0.000000e+00> : vector<9xf32>
    %140 = vector.multi_reduction <add>, %139, %cst_38 [1] : vector<9x9xf32> to vector<9xf32>
    %141 = vector.shape_cast %140 : vector<9xf32> to vector<9x1xf32>
    %142 = tpu.reciprocal %141 {approx = true} : vector<9x1xf32> -> vector<9x1xf32>
    %143 = vector.broadcast %142 : vector<9x1xf32> to vector<9x9xf32>
    %144 = arith.mulf %139, %143 : vector<9x9xf32>
    %145 = arith.truncf %144 : vector<9x9xf32> to vector<9x9xbf16>
    %cst_39 = arith.constant dense<0.000000e+00> : vector<9x16xf32>
    %146 = tpu.matmul %145, %131, %cst_39 {dimension_numbers = #tpu.dot_dimension_numbers<[1], [0], [0], [1], [0, 0, 1, 1], [], []>} : vector<9x9xbf16>, vector<9x16xbf16>, vector<9x16xf32> -> vector<9x16xf32>
    %147 = vector.extract_strided_slice %41 {offsets = [0, 80], sizes = [9, 16], strides = [1, 1]} : vector<9x384xf32> to vector<9x16xf32>
    %148 = arith.truncf %147 : vector<9x16xf32> to vector<9x16xbf16>
    %149 = vector.extract_strided_slice %41 {offsets = [0, 208], sizes = [9, 16], strides = [1, 1]} : vector<9x384xf32> to vector<9x16xf32>
    %150 = arith.truncf %149 : vector<9x16xf32> to vector<9x16xbf16>
    %151 = vector.extract_strided_slice %41 {offsets = [0, 336], sizes = [9, 16], strides = [1, 1]} : vector<9x384xf32> to vector<9x16xf32>
    %152 = arith.truncf %151 : vector<9x16xf32> to vector<9x16xbf16>
    %cst_40 = arith.constant dense<0.000000e+00> : vector<9x9xf32>
    %153 = tpu.matmul %148, %150, %cst_40 {dimension_numbers = #tpu.dot_dimension_numbers<[1], [1], [0], [0], [0, 0, 1, 0], [], []>} : vector<9x16xbf16>, vector<9x16xbf16>, vector<9x9xf32> -> vector<9x9xf32>
    %cst_41 = arith.constant 2.500000e-01 : f32
    %154 = vector.broadcast %cst_41 : f32 to vector<9x9xf32>
    %155 = arith.mulf %153, %154 : vector<9x9xf32>
    %cst_42 = arith.constant dense<0xFF800000> : vector<9xf32>
    %156 = vector.multi_reduction <maximumf>, %155, %cst_42 [1] : vector<9x9xf32> to vector<9xf32>
    %157 = vector.shape_cast %156 : vector<9xf32> to vector<9x1xf32>
    %158 = vector.broadcast %157 : vector<9x1xf32> to vector<9x9xf32>
    %159 = arith.subf %155, %158 : vector<9x9xf32>
    %160 = math.exp %159 : vector<9x9xf32>
    %cst_43 = arith.constant dense<0.000000e+00> : vector<9xf32>
    %161 = vector.multi_reduction <add>, %160, %cst_43 [1] : vector<9x9xf32> to vector<9xf32>
    %162 = vector.shape_cast %161 : vector<9xf32> to vector<9x1xf32>
    %163 = tpu.reciprocal %162 {approx = true} : vector<9x1xf32> -> vector<9x1xf32>
    %164 = vector.broadcast %163 : vector<9x1xf32> to vector<9x9xf32>
    %165 = arith.mulf %160, %164 : vector<9x9xf32>
    %166 = arith.truncf %165 : vector<9x9xf32> to vector<9x9xbf16>
    %cst_44 = arith.constant dense<0.000000e+00> : vector<9x16xf32>
    %167 = tpu.matmul %166, %152, %cst_44 {dimension_numbers = #tpu.dot_dimension_numbers<[1], [0], [0], [1], [0, 0, 1, 1], [], []>} : vector<9x9xbf16>, vector<9x16xbf16>, vector<9x16xf32> -> vector<9x16xf32>
    %168 = vector.extract_strided_slice %41 {offsets = [0, 96], sizes = [9, 16], strides = [1, 1]} : vector<9x384xf32> to vector<9x16xf32>
    %169 = arith.truncf %168 : vector<9x16xf32> to vector<9x16xbf16>
    %170 = vector.extract_strided_slice %41 {offsets = [0, 224], sizes = [9, 16], strides = [1, 1]} : vector<9x384xf32> to vector<9x16xf32>
    %171 = arith.truncf %170 : vector<9x16xf32> to vector<9x16xbf16>
    %172 = vector.extract_strided_slice %41 {offsets = [0, 352], sizes = [9, 16], strides = [1, 1]} : vector<9x384xf32> to vector<9x16xf32>
    %173 = arith.truncf %172 : vector<9x16xf32> to vector<9x16xbf16>
    %cst_45 = arith.constant dense<0.000000e+00> : vector<9x9xf32>
    %174 = tpu.matmul %169, %171, %cst_45 {dimension_numbers = #tpu.dot_dimension_numbers<[1], [1], [0], [0], [0, 0, 1, 0], [], []>} : vector<9x16xbf16>, vector<9x16xbf16>, vector<9x9xf32> -> vector<9x9xf32>
    %cst_46 = arith.constant 2.500000e-01 : f32
    %175 = vector.broadcast %cst_46 : f32 to vector<9x9xf32>
    %176 = arith.mulf %174, %175 : vector<9x9xf32>
    %cst_47 = arith.constant dense<0xFF800000> : vector<9xf32>
    %177 = vector.multi_reduction <maximumf>, %176, %cst_47 [1] : vector<9x9xf32> to vector<9xf32>
    %178 = vector.shape_cast %177 : vector<9xf32> to vector<9x1xf32>
    %179 = vector.broadcast %178 : vector<9x1xf32> to vector<9x9xf32>
    %180 = arith.subf %176, %179 : vector<9x9xf32>
    %181 = math.exp %180 : vector<9x9xf32>
    %cst_48 = arith.constant dense<0.000000e+00> : vector<9xf32>
    %182 = vector.multi_reduction <add>, %181, %cst_48 [1] : vector<9x9xf32> to vector<9xf32>
    %183 = vector.shape_cast %182 : vector<9xf32> to vector<9x1xf32>
    %184 = tpu.reciprocal %183 {approx = true} : vector<9x1xf32> -> vector<9x1xf32>
    %185 = vector.broadcast %184 : vector<9x1xf32> to vector<9x9xf32>
    %186 = arith.mulf %181, %185 : vector<9x9xf32>
    %187 = arith.truncf %186 : vector<9x9xf32> to vector<9x9xbf16>
    %cst_49 = arith.constant dense<0.000000e+00> : vector<9x16xf32>
    %188 = tpu.matmul %187, %173, %cst_49 {dimension_numbers = #tpu.dot_dimension_numbers<[1], [0], [0], [1], [0, 0, 1, 1], [], []>} : vector<9x9xbf16>, vector<9x16xbf16>, vector<9x16xf32> -> vector<9x16xf32>
    %189 = vector.extract_strided_slice %41 {offsets = [0, 112], sizes = [9, 16], strides = [1, 1]} : vector<9x384xf32> to vector<9x16xf32>
    %190 = arith.truncf %189 : vector<9x16xf32> to vector<9x16xbf16>
    %191 = vector.extract_strided_slice %41 {offsets = [0, 240], sizes = [9, 16], strides = [1, 1]} : vector<9x384xf32> to vector<9x16xf32>
    %192 = arith.truncf %191 : vector<9x16xf32> to vector<9x16xbf16>
    %193 = vector.extract_strided_slice %41 {offsets = [0, 368], sizes = [9, 16], strides = [1, 1]} : vector<9x384xf32> to vector<9x16xf32>
    %194 = arith.truncf %193 : vector<9x16xf32> to vector<9x16xbf16>
    %cst_50 = arith.constant dense<0.000000e+00> : vector<9x9xf32>
    %195 = tpu.matmul %190, %192, %cst_50 {dimension_numbers = #tpu.dot_dimension_numbers<[1], [1], [0], [0], [0, 0, 1, 0], [], []>} : vector<9x16xbf16>, vector<9x16xbf16>, vector<9x9xf32> -> vector<9x9xf32>
    %cst_51 = arith.constant 2.500000e-01 : f32
    %196 = vector.broadcast %cst_51 : f32 to vector<9x9xf32>
    %197 = arith.mulf %195, %196 : vector<9x9xf32>
    %cst_52 = arith.constant dense<0xFF800000> : vector<9xf32>
    %198 = vector.multi_reduction <maximumf>, %197, %cst_52 [1] : vector<9x9xf32> to vector<9xf32>
    %199 = vector.shape_cast %198 : vector<9xf32> to vector<9x1xf32>
    %200 = vector.broadcast %199 : vector<9x1xf32> to vector<9x9xf32>
    %201 = arith.subf %197, %200 : vector<9x9xf32>
    %202 = math.exp %201 : vector<9x9xf32>
    %cst_53 = arith.constant dense<0.000000e+00> : vector<9xf32>
    %203 = vector.multi_reduction <add>, %202, %cst_53 [1] : vector<9x9xf32> to vector<9xf32>
    %204 = vector.shape_cast %203 : vector<9xf32> to vector<9x1xf32>
    %205 = tpu.reciprocal %204 {approx = true} : vector<9x1xf32> -> vector<9x1xf32>
    %206 = vector.broadcast %205 : vector<9x1xf32> to vector<9x9xf32>
    %207 = arith.mulf %202, %206 : vector<9x9xf32>
    %208 = arith.truncf %207 : vector<9x9xf32> to vector<9x9xbf16>
    %cst_54 = arith.constant dense<0.000000e+00> : vector<9x16xf32>
    %209 = tpu.matmul %208, %194, %cst_54 {dimension_numbers = #tpu.dot_dimension_numbers<[1], [0], [0], [1], [0, 0, 1, 1], [], []>} : vector<9x9xbf16>, vector<9x16xbf16>, vector<9x16xf32> -> vector<9x16xf32>
    %210 = tpu.concatenate %62, %83, %104, %125, %146, %167, %188, %209 in 1 : vector<9x16xf32>, vector<9x16xf32>, vector<9x16xf32>, vector<9x16xf32>, vector<9x16xf32>, vector<9x16xf32>, vector<9x16xf32>, vector<9x16xf32> -> vector<9x128xf32>
    %211 = arith.truncf %210 : vector<9x128xf32> to vector<9x128xbf16>
    %212 = arith.index_cast %arg1 : i32 to index
    %c0_55 = arith.constant 0 : index
    %c0_56 = arith.constant 0 : index
    %213 = vector.load %arg8[%212, %c0_55, %c0_56] : memref<2x128x128xbf16, #tpu.memory_space<vmem>>, vector<1x128x128xbf16>
    %214 = vector.shape_cast %213 : vector<1x128x128xbf16> to vector<128x128xbf16>
    %cst_57 = arith.constant dense<0.000000e+00> : vector<9x128xf32>
    %215 = tpu.matmul %211, %214, %cst_57 {dimension_numbers = #tpu.dot_dimension_numbers<[1], [0], [0], [1], [0, 0, 1, 1], [], []>} : vector<9x128xbf16>, vector<128x128xbf16>, vector<9x128xf32> -> vector<9x128xf32>
    %216 = arith.index_cast %arg1 : i32 to index
    %c0_58 = arith.constant 0 : index
    %c0_59 = arith.constant 0 : index
    %217 = vector.load %arg9[%216, %c0_58, %c0_59] : memref<2x1x128xf32, #tpu.memory_space<vmem>>, vector<1x1x128xf32>
    %218 = vector.shape_cast %217 : vector<1x1x128xf32> to vector<1x128xf32>
    %219 = vector.broadcast %218 : vector<1x128xf32> to vector<9x128xf32>
    %220 = arith.addf %215, %219 : vector<9x128xf32>
    %221 = vector.extract_strided_slice %3 {offsets = [0, 0], sizes = [8, 128], strides = [1, 1]} : vector<9x128xf32> to vector<8x128xf32>
    %222 = vector.extract_strided_slice %220 {offsets = [0, 0], sizes = [8, 128], strides = [1, 1]} : vector<9x128xf32> to vector<8x128xf32>
    %223 = arith.addf %221, %222 : vector<8x128xf32>
    %cst_60 = arith.constant dense<0.000000e+00> : vector<8xf32>
    %224 = vector.multi_reduction <add>, %223, %cst_60 [1] : vector<8x128xf32> to vector<8xf32>
    %225 = vector.shape_cast %224 : vector<8xf32> to vector<8x1xf32>
    %cst_61 = arith.constant 1.280000e+02 : f32
    %226 = vector.broadcast %cst_61 : f32 to vector<8x1xf32>
    %227 = arith.divf %225, %226 : vector<8x1xf32>
    %228 = vector.broadcast %227 : vector<8x1xf32> to vector<8x128xf32>
    %229 = arith.subf %223, %228 : vector<8x128xf32>
    %230 = arith.mulf %229, %229 : vector<8x128xf32>
    %cst_62 = arith.constant dense<0.000000e+00> : vector<8xf32>
    %231 = vector.multi_reduction <add>, %230, %cst_62 [1] : vector<8x128xf32> to vector<8xf32>
    %232 = vector.shape_cast %231 : vector<8xf32> to vector<8x1xf32>
    %cst_63 = arith.constant 0.00787401571 : f32
    %233 = vector.broadcast %cst_63 : f32 to vector<8x1xf32>
    %234 = arith.mulf %232, %233 : vector<8x1xf32>
    %cst_64 = arith.constant 9.99999997E-7 : f32
    %235 = vector.broadcast %cst_64 : f32 to vector<8x1xf32>
    %236 = arith.addf %234, %235 : vector<8x1xf32>
    %237 = math.rsqrt %236 : vector<8x1xf32>
    %238 = vector.broadcast %227 : vector<8x1xf32> to vector<8x128xf32>
    %239 = arith.subf %223, %238 : vector<8x128xf32>
    %240 = vector.broadcast %237 : vector<8x1xf32> to vector<8x128xf32>
    %241 = arith.mulf %239, %240 : vector<8x128xf32>
    %242 = arith.truncf %241 : vector<8x128xf32> to vector<8x128xbf16>
    %243 = arith.index_cast %arg1 : i32 to index
    %c0_65 = arith.constant 0 : index
    %c0_66 = arith.constant 0 : index
    %244 = vector.load %arg10[%243, %c0_65, %c0_66] : memref<2x128x256xbf16, #tpu.memory_space<vmem>>, vector<1x128x256xbf16>
    %245 = vector.shape_cast %244 : vector<1x128x256xbf16> to vector<128x256xbf16>
    %cst_67 = arith.constant dense<0.000000e+00> : vector<8x256xf32>
    %246 = tpu.matmul %242, %245, %cst_67 {dimension_numbers = #tpu.dot_dimension_numbers<[1], [0], [0], [1], [0, 0, 1, 1], [], []>} : vector<8x128xbf16>, vector<128x256xbf16>, vector<8x256xf32> -> vector<8x256xf32>
    %247 = arith.index_cast %arg1 : i32 to index
    %c0_68 = arith.constant 0 : index
    %c0_69 = arith.constant 0 : index
    %248 = vector.load %arg11[%247, %c0_68, %c0_69] : memref<2x1x256xf32, #tpu.memory_space<vmem>>, vector<1x1x256xf32>
    %249 = vector.shape_cast %248 : vector<1x1x256xf32> to vector<1x256xf32>
    %250 = vector.broadcast %249 : vector<1x256xf32> to vector<8x256xf32>
    %251 = arith.addf %246, %250 : vector<8x256xf32>
    %cst_70 = arith.constant 0.000000e+00 : f32
    %252 = vector.broadcast %cst_70 : f32 to vector<8x256xf32>
    %253 = arith.maximumf %251, %252 : vector<8x256xf32>
    %254 = arith.truncf %253 : vector<8x256xf32> to vector<8x256xbf16>
    %255 = arith.index_cast %arg1 : i32 to index
    %c0_71 = arith.constant 0 : index
    %c0_72 = arith.constant 0 : index
    %256 = vector.load %arg12[%255, %c0_71, %c0_72] : memref<2x256x128xbf16, #tpu.memory_space<vmem>>, vector<1x256x128xbf16>
    %257 = vector.shape_cast %256 : vector<1x256x128xbf16> to vector<256x128xbf16>
    %cst_73 = arith.constant dense<0.000000e+00> : vector<8x128xf32>
    %258 = tpu.matmul %254, %257, %cst_73 {dimension_numbers = #tpu.dot_dimension_numbers<[1], [0], [0], [1], [0, 0, 1, 1], [], []>} : vector<8x256xbf16>, vector<256x128xbf16>, vector<8x128xf32> -> vector<8x128xf32>
    %259 = arith.index_cast %arg1 : i32 to index
    %c0_74 = arith.constant 0 : index
    %c0_75 = arith.constant 0 : index
    %260 = vector.load %arg13[%259, %c0_74, %c0_75] : memref<2x1x128xf32, #tpu.memory_space<vmem>>, vector<1x1x128xf32>
    %261 = vector.shape_cast %260 : vector<1x1x128xf32> to vector<1x128xf32>
    %262 = vector.broadcast %261 : vector<1x128xf32> to vector<8x128xf32>
    %263 = arith.addf %258, %262 : vector<8x128xf32>
    %cst_76 = arith.constant 2.000000e+00 : f32
    %264 = vector.broadcast %cst_76 : f32 to vector<8x128xf32>
    %265 = arith.mulf %264, %223 : vector<8x128xf32>
    %266 = arith.addf %265, %263 : vector<8x128xf32>
    %c0_77 = arith.constant 0 : index
    %c0_78 = arith.constant 0 : index
    %267 = vector.load %arg17[%c0_77, %c0_78] : memref<9x128xf32, #tpu.memory_space<vmem>>, vector<8x128xf32>
    tpu.vector_store %arg17[%c0_77, %c0_78], %266 {strides = array<i32>} : memref<9x128xf32, #tpu.memory_space<vmem>>, vector<8x128xf32>,
    %c1_i32 = arith.constant 1 : i32
    %268 = arith.cmpi eq, %arg1, %c1_i32 : i32
    %269 = arith.extui %268 : i1 to i32
    %c0_i32_79 = arith.constant 0 : i32
    %270 = arith.cmpi ne, %269, %c0_i32_79 : i32
    scf.if %270 {
      %c0_80 = arith.constant 0 : index
      %c0_81 = arith.constant 0 : index
      %271 = vector.load %arg14[%c0_80, %c0_81] : memref<1x128xf32, #tpu.memory_space<vmem>>, vector<1x128xf32>
      %c0_82 = arith.constant 0 : index
      %c0_83 = arith.constant 0 : index
      %272 = vector.load %arg15[%c0_82, %c0_83] : memref<1x128xf32, #tpu.memory_space<vmem>>, vector<1x128xf32>
      %cst_84 = arith.constant dense<0.000000e+00> : vector<8xf32>
      %273 = vector.multi_reduction <add>, %266, %cst_84 [1] : vector<8x128xf32> to vector<8xf32>
      %274 = vector.shape_cast %273 : vector<8xf32> to vector<8x1xf32>
      %cst_85 = arith.constant 1.280000e+02 : f32
      %275 = vector.broadcast %cst_85 : f32 to vector<8x1xf32>
      %276 = arith.divf %274, %275 : vector<8x1xf32>
      %277 = vector.broadcast %276 : vector<8x1xf32> to vector<8x128xf32>
      %278 = arith.subf %266, %277 : vector<8x128xf32>
      %279 = arith.mulf %278, %278 : vector<8x128xf32>
      %cst_86 = arith.constant dense<0.000000e+00> : vector<8xf32>
      %280 = vector.multi_reduction <add>, %279, %cst_86 [1] : vector<8x128xf32> to vector<8xf32>
      %281 = vector.shape_cast %280 : vector<8xf32> to vector<8x1xf32>
      %cst_87 = arith.constant 0.00787401571 : f32
      %282 = vector.broadcast %cst_87 : f32 to vector<8x1xf32>
      %283 = arith.mulf %281, %282 : vector<8x1xf32>
      %cst_88 = arith.constant 9.99999997E-7 : f32
      %284 = vector.broadcast %cst_88 : f32 to vector<8x1xf32>
      %285 = arith.addf %283, %284 : vector<8x1xf32>
      %286 = math.rsqrt %285 : vector<8x1xf32>
      %287 = vector.broadcast %276 : vector<8x1xf32> to vector<8x128xf32>
      %288 = arith.subf %266, %287 : vector<8x128xf32>
      %289 = vector.broadcast %271 : vector<1x128xf32> to vector<8x128xf32>
      %290 = arith.mulf %289, %288 : vector<8x128xf32>
      %291 = vector.broadcast %286 : vector<8x1xf32> to vector<8x128xf32>
      %292 = arith.mulf %290, %291 : vector<8x128xf32>
      %293 = vector.broadcast %272 : vector<1x128xf32> to vector<8x128xf32>
      %294 = arith.addf %292, %293 : vector<8x128xf32>
      %c0_89 = arith.constant 0 : index
      %c0_90 = arith.constant 0 : index
      %c0_91 = arith.constant 0 : index
      %295 = vector.load %arg16[%c0_89, %c0_90, %c0_91] : memref<1x8x128xf32, #tpu.memory_space<vmem>>, vector<1x8x128xf32>
      %296 = vector.shape_cast %295 : vector<1x8x128xf32> to vector<8x128xf32>
      %297 = vector.shape_cast %294 : vector<8x128xf32> to vector<1x8x128xf32>
      tpu.vector_store %arg16[%c0_89, %c0_90, %c0_91], %297 {strides = array<i32>} : memref<1x8x128xf32, #tpu.memory_space<vmem>>, vector<1x8x128xf32>,
    } else {
    }
    return
  }
  func.func @transform_0(%arg0: i32, %arg1: i32) -> (i32, i32, i32) {
    %c0_i32 = arith.constant 0 : i32
    %c0_i32_0 = arith.constant 0 : i32
    %c0_i32_1 = arith.constant 0 : i32
    return %arg0, %c0_i32, %c0_i32_0 : i32, i32, i32
  }
  func.func @transform_1(%arg0: i32, %arg1: i32) -> (i32, i32, i32) {
    %c0_i32 = arith.constant 0 : i32
    %c0_i32_0 = arith.constant 0 : i32
    %c0_i32_1 = arith.constant 0 : i32
    return %arg0, %c0_i32, %c0_i32_0 : i32, i32, i32
  }
  func.func @transform_2(%arg0: i32, %arg1: i32) -> (i32, i32, i32) {
    %c0_i32 = arith.constant 0 : i32
    %c0_i32_0 = arith.constant 0 : i32
    %c0_i32_1 = arith.constant 0 : i32
    %c0_i32_2 = arith.constant 0 : i32
    return %c0_i32, %c0_i32_0, %c0_i32_1 : i32, i32, i32
  }
  func.func @transform_3(%arg0: i32, %arg1: i32) -> (i32, i32, i32) {
    %c0_i32 = arith.constant 0 : i32
    %c0_i32_0 = arith.constant 0 : i32
    %c0_i32_1 = arith.constant 0 : i32
    %c0_i32_2 = arith.constant 0 : i32
    return %c0_i32, %c0_i32_0, %c0_i32_1 : i32, i32, i32
  }
  func.func @transform_4(%arg0: i32, %arg1: i32) -> (i32, i32, i32) {
    %c0_i32 = arith.constant 0 : i32
    %c0_i32_0 = arith.constant 0 : i32
    %c0_i32_1 = arith.constant 0 : i32
    %c0_i32_2 = arith.constant 0 : i32
    return %c0_i32, %c0_i32_0, %c0_i32_1 : i32, i32, i32
  }
  func.func @transform_5(%arg0: i32, %arg1: i32) -> (i32, i32, i32) {
    %c0_i32 = arith.constant 0 : i32
    %c0_i32_0 = arith.constant 0 : i32
    %c0_i32_1 = arith.constant 0 : i32
    %c0_i32_2 = arith.constant 0 : i32
    return %c0_i32, %c0_i32_0, %c0_i32_1 : i32, i32, i32
  }
  func.func @transform_6(%arg0: i32, %arg1: i32) -> (i32, i32, i32) {
    %c0_i32 = arith.constant 0 : i32
    %c0_i32_0 = arith.constant 0 : i32
    %c0_i32_1 = arith.constant 0 : i32
    %c0_i32_2 = arith.constant 0 : i32
    return %c0_i32, %c0_i32_0, %c0_i32_1 : i32, i32, i32
  }
  func.func @transform_7(%arg0: i32, %arg1: i32) -> (i32, i32, i32) {
    %c0_i32 = arith.constant 0 : i32
    %c0_i32_0 = arith.constant 0 : i32
    %c0_i32_1 = arith.constant 0 : i32
    %c0_i32_2 = arith.constant 0 : i32
    return %c0_i32, %c0_i32_0, %c0_i32_1 : i32, i32, i32
  }
  func.func @transform_8(%arg0: i32, %arg1: i32) -> (i32, i32, i32) {
    %c0_i32 = arith.constant 0 : i32
    %c0_i32_0 = arith.constant 0 : i32
    %c0_i32_1 = arith.constant 0 : i32
    %c0_i32_2 = arith.constant 0 : i32
    return %c0_i32, %c0_i32_0, %c0_i32_1 : i32, i32, i32
  }
  func.func @transform_9(%arg0: i32, %arg1: i32) -> (i32, i32, i32) {
    %c0_i32 = arith.constant 0 : i32
    %c0_i32_0 = arith.constant 0 : i32
    %c0_i32_1 = arith.constant 0 : i32
    %c0_i32_2 = arith.constant 0 : i32
    return %c0_i32, %c0_i32_0, %c0_i32_1 : i32, i32, i32
  }
  func.func @transform_10(%arg0: i32, %arg1: i32) -> (i32, i32, i32) {
    %c0_i32 = arith.constant 0 : i32
    %c0_i32_0 = arith.constant 0 : i32
    %c0_i32_1 = arith.constant 0 : i32
    %c0_i32_2 = arith.constant 0 : i32
    return %c0_i32, %c0_i32_0, %c0_i32_1 : i32, i32, i32
  }
  func.func @transform_11(%arg0: i32, %arg1: i32) -> (i32, i32, i32) {
    %c0_i32 = arith.constant 0 : i32
    %c0_i32_0 = arith.constant 0 : i32
    %c0_i32_1 = arith.constant 0 : i32
    %c0_i32_2 = arith.constant 0 : i32
    return %c0_i32, %c0_i32_0, %c0_i32_1 : i32, i32, i32
  }
  func.func @transform_12(%arg0: i32, %arg1: i32) -> (i32, i32) {
    %c0_i32 = arith.constant 0 : i32
    %c0_i32_0 = arith.constant 0 : i32
    %c0_i32_1 = arith.constant 0 : i32
    return %c0_i32, %c0_i32_0 : i32, i32
  }
  func.func @transform_13(%arg0: i32, %arg1: i32) -> (i32, i32) {
    %c0_i32 = arith.constant 0 : i32
    %c0_i32_0 = arith.constant 0 : i32
    %c0_i32_1 = arith.constant 0 : i32
    return %c0_i32, %c0_i32_0 : i32, i32
  }
  func.func @transform_14(%arg0: i32, %arg1: i32) -> (i32, i32, i32) {
    %c0_i32 = arith.constant 0 : i32
    %c0_i32_0 = arith.constant 0 : i32
    %c0_i32_1 = arith.constant 0 : i32
    return %arg0, %c0_i32, %c0_i32_0 : i32, i32, i32
  }
}

</mosaic_0001>

<bundles_post_ra>
// kernel: world_decoder_forward.1
= control target key start
LH: loop header
LB: loop body
LE: loop exit
PB: predicated region body
PF: predicated region fallthrough
CT: control target
= control target key end

     0   :  { %s3861_s0 = inlined_call_operand.vmem [shape: f32[2,8,128], index: 0, kind: input, shape index: {}]   ;;  %s3862_s1 = inlined_call_operand.vmem [shape: f32[2,1,128], index: 1, kind: input, shape index: {}]   ;;  %s3863_s2 = inlined_call_operand.vmem [shape: f32[2,1,128], index: 2, kind: input, shape index: {}]   ;;  %s3864_s3 = inlined_call_operand.vmem [shape: f32[2,1,128], index: 3, kind: input, shape index: {}]   ;;  %s3865_s4 = inlined_call_operand.vmem [shape: bf16[2,128,384], index: 4, kind: input, shape index: {}]   ;;  %s3866_s5 = inlined_call_operand.vmem [shape: f32[2,1,384], index: 5, kind: input, shape index: {}]   ;;  %s3867_s6 = inlined_call_operand.vmem [shape: bf16[2,128,128], index: 6, kind: input, shape index: {}]   ;;  %s3868_s7 = inlined_call_operand.vmem [shape: f32[2,1,128], index: 7, kind: input, shape index: {}]   ;;  %s3869_s8 = inlined_call_operand.vmem [shape: bf16[2,128,256], index: 8, kind: input, shape index: {}]   ;;  %s3870_s9 = inlined_call_operand.vmem [shape: f32[2,1,256], index: 9, kind: input, shape index: {}]   ;;  %s3871_s10 = inlined_call_operand.vmem [shape: bf16[2,256,128], index: 10, kind: input, shape index: {}]   ;;  %s3872_s11 = inlined_call_operand.vmem [shape: f32[2,1,128], index: 11, kind: input, shape index: {}]   ;;  %s3873_s12 = inlined_call_operand.vmem [shape: f32[1,128], index: 12, kind: input, shape index: {}]   ;;  %s3874_s13 = inlined_call_operand.vmem [shape: f32[1,128], index: 13, kind: input, shape index: {}]   ;;  %s3875_s14 = inlined_call_operand.hbm [shape: f32[2,8,128], index: 14, kind: output, shape index: {}]  }
   0x1   :  { %3885 = sst [smem:[#allocation14_spill]] %s3861_s0 }
   0x2   :  { %19 = vsyncpa [#allocation4], 0 }
   0x3   :  { %21 = vsyncpa [#allocation4 + $0x1], 0  ;;  %s3276_s29 = smov 0   ;;  %s3278_s30 = smov 0  }
   0x4   :  { %s3280_s15 = smov 0   ;;  %s3282_s16 = smov 0  }
   0x5   :  { %s3284_s17 = smov 0   ;;  %s3286_s18 = smov 0  }
   0x6   :  { %s3288_s19 = smov 0   ;;  %s3290_s20 = smov 0  }
   0x7 LB: > { %3886 = sst [smem:[#allocation6_spill]] %s3159_s29  ;;  %s2505_s21 = sadd.s32 4294967295, %s3187_s20   ;;  %s3187_s20 = sphi %s3290_s20, %s27_s20   ;;  %s3183_s19 = sphi %s3288_s19, %s3908_s19   ;;  %s3179_s18 = sphi %s3286_s18, %s3907_s18   ;;  %s3175_s17 = sphi %s3284_s17, %s3912_s17   ;;  %s3171_s16 = sphi %s3282_s16, %s3905_s16   ;;  %s3167_s15 = sphi %s3280_s15, %s3911_s15   ;;  %s3163_s30 = sphi %s3278_s30, %s3910_s30   ;;  %s3159_s29 = sphi %s3276_s29, %s3909_s29  }
   0x8   : > { %3887 = sst [smem:[#allocation7_spill]] %s3179_s18  ;;  %s2506_s22 = sadd.s32 4294967294, %s3187_s20  }
   0x9   : > { %3888 = sst [smem:[#allocation8_spill]] %s3183_s19  ;;  %s36_s23 = sadd.s32 1, %s3179_s18 }
   0xa   : > { %3889 = sst [smem:[#allocation9_spill]] %s3187_s20  ;;  %p37_p0 = scmp.ge.s32.totalorder %s36_s23, 2 }
   0xb   : > { %s39_s24 = sadd.s32 1, %s3183_s19  ;;  %p360_p1 = scmp.ne.s32.totalorder %s3167_s15, %s3163_s30 }
   0xc   : > { %p361_p2 = scmp.eq.s32.totalorder %s2505_s21, 3  ;;  %s3914_s23 = smov (%p37_p0, %s36_s23), 0 }
   0xd   : > { %3890 = sst [smem:[#allocation10_spill]] %s3914_s23  ;;  %s3916_s24 = smov (!%p37_p0, %s39_s24), %s3183_s19 }
   0xe   : > { %p3325_p3 = por %p361_p2, %p360_p1  ;;  %p366_p4 = scmp.ne.s32.totalorder %s3163_s30, %s3159_s29 }
   0xf   : > { %p41_p5 = scmp.ge.s32.totalorder %s3916_s24, 2  ;;  %p367_p6 = scmp.eq.s32.totalorder %s2506_s22, 3 }
  0x10   : > { %p2509_p7 = scmp.ge.s32.totalorder %s3187_s20, 1  ;;  %p434_p8 = scmp.lt.s32.totalorder %s3187_s20, 5 }
  0x11   : > { %s3918_s24 = smov (%p41_p5, %s3916_s24), 0  ;;  %p3335_p9 = por %p367_p6, %p366_p4 }
  0x12   : > { %3892 = sst [smem:[#allocation11_spill]] %s3918_s24  ;;  %p435_p10 = pnand %p2509_p7, %p434_p8 }
  0x13   : > { %s3893_s26 = scalar_select %p3335_p9, 1, 0 }
  0x14   : > { %s347_s27 = ssub.s32 %s3183_s19, %s3918_s24  ;;  %s350_s28 = sadd.s32 1, %s3167_s15 }
  0x15   : > { %3894 = sst [smem:[#allocation12_spill]] %s3893_s26  ;;  %p348_p11 = scmp.eq.s32.totalorder %s347_s27, 0 }
  0x16   : > { %438 = sbr.rel (%p435_p10) target bundleno = 3524 (0xdc4), region = 76  ;;  %s3883_s22 = sand.u32 (!%p435_p10), 1, %s3163_s30  }
  0x17   : > { %s3343_s21 = scalar_select %p348_p11, %s3167_s15, %s350_s28  }
  0x18   : > { %p482_p12 = scmp.lt.s32.totalorder (!%p435_p10), %s3175_s17, 1  ;;  %s3349_s23 = sshll.u32 (!%p435_p10), %s3883_s22, 3 }
  0x19   : > { %3895 = sst [smem:[#allocation13_spill]] %s3343_s21  ;;  %s3896_s0 = sld [smem:[#allocation14_spill]] (!%p435_p10) }
  0x1a   : > { %p2512_p13 = scmp.ne.s32.totalorder (!%p435_p10), %s3171_s16, 0 }
  0x1d   : > { %s483_s18 = scalar_select %p482_p12, %s3175_s17, 1 }
  0x1e   : > { %493 = sbr.rel (%p2512_p13) target bundleno = 37 (0x25), region = 80 }
  0x1f   : > { %s2511_s29 = sshll.u32 %s483_s18, 3  ;;  %s488_s24 = scalar_lea.vmem %s3862_s1, %s483_s18 }
  0x20   : > { %s485_s19 = scalar_lea.vmem %s3896_s0, %s2511_s29  ;;  %v496_v1 = vld [vmem:[%s488_s24] sm:$0x1] (!%p2512_p13) }
  0x21   : > { %v494_v0 = vld [vmem:[%s485_s19] sm:$0xff] (!%p2512_p13)  ;;  %497 = vst [vmem:[#allocation2 + $0x8] sm:$0x1] (!%p2512_p13), %v496_v1 }
  0x22   : > { %495 = vst [vmem:[#allocation2] sm:$0xff] (!%p2512_p13), %v494_v0 }
  0x25 PF: > { %vm506_vm0 = vcmask 1040384   ;;  %s2611_s18 = smul.u32 192, %s3171_s16  ;;  %v3189_v5 = vmov 0.0   ;;  %v3190_v34 = vmov 0   ;;  %vm3191_vm1 = vmmov 0   ;;  %s500_s27 = scalar_lea.vmem %s3863_s2, %s3171_s16 }
  0x26   : > { %2687 = vmatprep.subr.bf16.mxu1 %v3189_v5  ;;  %761 = vmatprep.mubr.bf16.mxu0 %v3190_v34  ;;  %v2513_v47 = vld [vmem:[%s500_s27] ss:$0 sm:$0xff]  ;;  %s502_s29 = scalar_lea.vmem %s3864_s3, %s3171_s16  ;;  %v586_v57 = vlaneseq  ;;  %s582_s20 = smul.u32 3, %s3171_s16  ;;  %vm816_vm2 = vcmask 130048   ;;  %vm894_vm3 = vcmask 1043456   ;;  %vm895_vm4 = vcmask 1044480  }
  0x27   : > { %s3366_s19 = scalar_lea.vmem %s3865_s4, %s2611_s18  ;;  %2703 = vmatprep.mubr.msk.bf16.mxu1 %vm3191_vm1, %v3189_v5  ;;  %v2514_v52 = vld [vmem:[%s502_s29] ss:$0 sm:$0xff]  ;;  %vm866_vm5 = vcmask 72704   ;;  %vm870_vm6 = vcmask 65536   ;;  %s3884_s27 = smov 112   ;;  %vm1878_vm7 = vcmask 261120  }
  0x28   : > { %v499_v2 = vld [vmem:[#allocation2 + $0x8] sm:$0x1]  ;;  %v2940_v6 = vld [vmem:[%s3366_s19 + $0x4] ss:$12 sps:$4 sm:$0xff]   ;;  %v2942_v7 = vld [vmem:[%s3366_s19] ss:$12 sps:$4 sm:$0xff]   ;;  %s583_s26 = scalar_lea.vmem %s3866_s5, %s582_s20 }
  0x29   : > { %v507_v3 = vsel %vm506_vm0, %v499_v2, 0.0  ;;  %v498_v4 = vld [vmem:[#allocation2] sm:$0xff]  ;;  %729 = vmatprep.subr.bf16.mxu0 %v2940_v6  ;;  %v2943_v8 = vld [vmem:[%s3366_s19 + $0x8] ss:$12 sps:$4 sm:$0xff]   ;;  %v2950_v22 = vld [vmem:[%s3366_s19 + $0x30] ss:$12 sps:$4 sm:$0xff]  }
  0x2a   : > { %508 = vadd.xlane.f32.xlu0 %v507_v3  ;;  %730 = vmatpush1.bf16.msra.mxu0 %v2942_v7  ;;  %v2944_v9 = vld [vmem:[%s3366_s19 + $0x1c] ss:$12 sps:$4 sm:$0xff]   ;;  %v2946_v10 = vld [vmem:[%s3366_s19 + $0x18] ss:$12 sps:$4 sm:$0xff]   ;;  %v2947_v11 = vld [vmem:[%s3366_s19 + $0x20] ss:$12 sps:$4 sm:$0xff]  }
  0x2b   : > { %2688 = vmatpush3.bf16.msra.mxu1 %v2943_v8  ;;  %731 = vmatprep.subr.bf16.mxu0 %v2944_v9  ;;  %v2948_v21 = vld [vmem:[%s3366_s19 + $0x34] ss:$12 sps:$4 sm:$0xff]   ;;  %v2951_v23 = vld [vmem:[%s3366_s19 + $0x38] ss:$12 sps:$4 sm:$0xff]   ;;  %v2955_v26 = vld [vmem:[%s3366_s19 + $0x50] ss:$12 sps:$4 sm:$0xff]  }
  0x2c   : > { %2689 = vmatprep.subr.bf16.mxu1 %v3189_v5  ;;  %v2952_v24 = vld [vmem:[%s3366_s19 + $0x4c] ss:$12 sps:$4 sm:$0xff]   ;;  %v2954_v25 = vld [vmem:[%s3366_s19 + $0x48] ss:$12 sps:$4 sm:$0xff]   ;;  %v2956_v27 = vld [vmem:[%s3366_s19 + $0x64] ss:$12 sps:$4 sm:$0xff]  }
  0x2d   : > { %v2958_v28 = vld [vmem:[%s3366_s19 + $0x60] ss:$12 sps:$4 sm:$0xff]   ;;  %v2959_v29 = vld [vmem:[%s3366_s19 + $0x68] ss:$12 sps:$4 sm:$0xff]   ;;  %v2962_v31 = vld [vmem:[%s3366_s19 + $0x78] ss:$12 sps:$4 sm:$0xff]  }
  0x2e   : > { %504 = vadd.xlane.f32.xlu0 %v498_v4  ;;  %732 = vmatpush1.bf16.msra.mxu0 %v2946_v10  ;;  %v2960_v30 = vld [vmem:[%s3366_s19 + $0x7c] ss:$12 sps:$4 sm:$0xff]   ;;  %v2963_v32 = vld [vmem:[%s3366_s19 + $0x80] ss:$12 sps:$4 sm:$0xff]   ;;  %v2967_v36 = vld [vmem:[%s3366_s19 + $0x98] ss:$12 sps:$4 sm:$0xff]  }
  0x2f   : > { %2690 = vmatpush3.bf16.msra.mxu1 %v2947_v11  ;;  %733 = vmatprep.subr.bf16.mxu0 %v2948_v21  ;;  %v2964_v33 = vld [vmem:[%s3366_s19 + $0x94] ss:$12 sps:$4 sm:$0xff]   ;;  %v2966_v35 = vld [vmem:[%s3366_s19 + $0x90] ss:$12 sps:$4 sm:$0xff]   ;;  %v2968_v37 = vld [vmem:[%s3366_s19 + $0xac] ss:$12 sps:$4 sm:$0xff]  }
  0x30   : > { %2691 = vmatprep.subr.bf16.mxu1 %v3189_v5  ;;  %v2970_v38 = vld [vmem:[%s3366_s19 + $0xa8] ss:$12 sps:$4 sm:$0xff]   ;;  %v2971_v39 = vld [vmem:[%s3366_s19 + $0xb0] ss:$12 sps:$4 sm:$0xff]   ;;  %v3428_v58 = vshrl.u32 %v586_v57, 7  ;;  %v3192_v21 = vmov 65535  }
  0x31   : > { %v584_v61 = vld [vmem:[%s583_s26] sm:$0x7]  ;;  %s3194_s28 = smov 96   ;;  %s3195_s18 = smov 80   ;;  %vm1881_vm8 = vcmask 392192   ;;  %vm1884_vm9 = vcmask 523264  }
  0x32   : > { %734 = vmatpush1.bf16.msra.mxu0 %v2950_v22  ;;  %v588_v59 = vsub.s32 0, %v3428_v58  ;;  %v596_v60 = vsub.s32 2, %v3428_v58  ;;  %v592_v62 = vsub.s32 1, %v3428_v58  ;;  %v896_v22 = vsel %vm894_vm3, 4294967295, %v3192_v21  ;;  %s3196_s29 = smov 64   ;;  %s3197_s20 = smov 48  }
  0x33   : > { %2692 = vmatpush3.bf16.msra.mxu1 %v2951_v23  ;;  %735 = vmatprep.subr.bf16.mxu0 %v2952_v24  ;;  %v3444_v23 = vsel %vm895_vm4, %v896_v22, 0  ;;  %s3198_s19 = smov 32   ;;  %s3199_s24 = smov 16   ;;  %vm1887_vm10 = vcmask 654336   ;;  %vm1890_vm11 = vcmask 785408   ;;  %vm1893_vm12 = vcmask 916480  }
  0x34   : > { %2693 = vmatprep.subr.bf16.mxu1 %v3189_v5  ;;  %v589_v63 = vrot.slane %v584_v61, %v588_v59  ;;  %v597_v0 = vrot.slane %v584_v61, %v596_v60  ;;  %v593_v3 = vrot.slane %v584_v61, %v592_v62  ;;  %s2612_s26 = sshll.u32 %s3171_s16, 6  ;;  %s3897_s21 = smov 112  }
  0x35   : > { %s2569_s22 = sshll.u32 %s3171_s16, 1  ;;  %p2604_p0 = scmp.ne.s32.totalorder %s3171_s16, 1 }
  0x36   : > { %736 = vmatpush1.bf16.msra.mxu0 %v2954_v25 }
  0x37   : > { %2694 = vmatpush3.bf16.msra.mxu1 %v2955_v26  ;;  %737 = vmatprep.subr.bf16.mxu0 %v2956_v27 }
  0x38   : > { %2695 = vmatprep.subr.bf16.mxu1 %v3189_v5 }
  0x3a   : > { %738 = vmatpush1.bf16.msra.mxu0 %v2958_v28 }
  0x3b   : > { %2696 = vmatpush3.bf16.msra.mxu1 %v2959_v29  ;;  %739 = vmatprep.subr.bf16.mxu0 %v2960_v30 }
  0x3c   : > { %2697 = vmatprep.subr.bf16.mxu1 %v3189_v5 }
  0x3e   : > { %740 = vmatpush1.bf16.msra.mxu0 %v2962_v31 }
  0x3f   : > { %2698 = vmatpush3.bf16.msra.mxu1 %v2963_v32  ;;  %741 = vmatprep.subr.bf16.mxu0 %v2964_v33 }
  0x40   : > { %2699 = vmatprep.subr.bf16.mxu1 %v3189_v5 }
  0x42   : > { %742 = vmatpush1.bf16.msra.mxu0 %v2966_v35 }
  0x43   : > { %2700 = vmatpush3.bf16.msra.mxu1 %v2967_v36  ;;  %743 = vmatprep.subr.bf16.mxu0 %v2968_v37 }
  0x44   : > { %2701 = vmatprep.subr.bf16.mxu1 %v3189_v5 }
  0x46   : > { %744 = vmatpush1.bf16.msra.mxu0 %v2970_v38 }
  0x47   : > { %2702 = vmatpush3.bf16.msra.mxu1 %v2971_v39  ;;  %2731 = vmatprep.subr.bf16.mxu0 %v3189_v5 }
  0x48   : > { %2707 = vmatprep.subr.bf16.mxu1 %v3189_v5 }
  0xb7   : > { %v509_v12 = vpop.xlane.xlu0 %508 }
  0xb8   : > { %v512_v13 = vmul.f32 0.0078125, %v509_v12 }
  0xba   : > { %v3376_v16 = vsub.f32 %v499_v2, %v512_v13 }
  0xbb   : > { %v505_v14 = vpop.xlane.xlu0 %504 }
  0xbc   : > { %v511_v15 = vmul.f32 0.0078125, %v505_v14  ;;  %v516_v19 = vmul.f32 %v3376_v16, %v3376_v16  ;;  %v535_v49 = vmul.f32 %v2513_v47, %v3376_v16 }
  0xbe   : > { %v3378_v17 = vsub.f32 %v498_v4, %v511_v15  ;;  %v519_v20 = vsel %vm506_vm0, %v516_v19, 0.0 }
  0xc0   : > { %v515_v18 = vmul.f32 %v3378_v17, %v3378_v17  ;;  %v534_v48 = vmul.f32 %v2513_v47, %v3378_v17 }
  0xc2   : > { %517 = vadd.xlane.f32.xlu1 %v515_v18 }
  0xc6   : > { %520 = vadd.xlane.f32.xlu1 %v519_v20 }
 0x14f   : > { %v518_v40 = vpop.xlane.xlu1 %517 }
 0x150   : > { %v522_v41 = vmul.f32 0.007874016, %v518_v40 }
 0x152   : > { %v524_v42 = vadd.f32 1e-06, %v522_v41 }
 0x153   : > { %v521_v43 = vpop.xlane.xlu1 %520 }
 0x154   : > { %3020 = vrsqrt.f32 %v524_v42  ;;  %v523_v44 = vmul.f32 0.007874016, %v521_v43 }
 0x156   : > { %v525_v45 = vadd.f32 1e-06, %v523_v44 }
 0x158   : > { %3022 = vrsqrt.f32 %v525_v45 }
 0x15e   : > { %v3021_v46 = vpop.eup %3020 }
 0x15f   : > { %v536_v50 = vmul.f32 %v3021_v46, %v534_v48 }
 0x161   : > { %v544_v54 = vadd.f32 %v2514_v52, %v536_v50 }
 0x162   : > { %v3023_v51 = vpop.eup %3022 }
 0x163   : > { %v537_v53 = vmul.f32 %v3023_v51, %v535_v49 }
 0x165   : > { %v545_v55 = vadd.f32 %v2514_v52, %v537_v53 }
 0x167   : > { %v546_v56 = vpack.c.bf16 %v545_v55, %v544_v54 }
 0x169   : > { %762 = vmatmul.mubr.bf16.vlgmr.msra.gmra.mrb[0].mxu0 %v546_v56  ;;  %2704 = vmatmul.mubr.bf16.vlgmr.msra.gmra.mrb[0].mxu1 %v546_v56 }
 0x16a   : > { %2709 = vmatprep.mubr.msk.bf16.mxu1 %vm3191_vm1, %v3189_v5  ;;  %2733 = vmatprep.mubr.msk.bf16.mxu0 %vm3191_vm1, %v3189_v5 }
 0x23c   : > { %v763_v1 = vpop.f32.mrb[0].mxu0  ;;  %v806_v2 = vpop.f32.mrb[0].mxu1 }
 0x23d   : > { %v765_v4 = vpop.f32.mrb[1].mxu0  ;;  %v2705_v6 = vpop.f32.mrb[1].mxu1  ;;  %v764_v9 = vadd.f32 %v763_v1, %v589_v63  ;;  %v807_v10 = vadd.f32 %v806_v2, %v597_v0 }
 0x23e   : > { %v767_v7 = vpop.f32.mrb[2].mxu0  ;;  %v809_v8 = vpop.f32.mrb[2].mxu1  ;;  %v766_v15 = vadd.f32 %v765_v4, %v593_v3 }
 0x23f   : > { %v768_v11 = vadd.f32 %v767_v7, %v589_v63  ;;  %v810_v12 = vadd.f32 %v809_v8, %v597_v0  ;;  %v769_v13 = vpop.f32.mrb[3].mxu0  ;;  %v2706_v14 = vpop.f32.mrb[3].mxu1 }
 0x240   : > { %v770_v16 = vadd.f32 %v769_v13, %v593_v3 }
 0x241   : > { %v813_v17 = vpack.c.bf16 %v768_v11, %v764_v9  ;;  %v3440_v18 = vpack.c.bf16 %v810_v12, %v807_v10 }
 0x242   : > { %v814_v19 = vpack.c.bf16 %v770_v16, %v766_v15 }
 0x243   : > { %v899_v24 = vand.u32 %v3444_v23, %v3440_v18 }
 0x244   : > { %v821_v20 = vsel %vm816_vm2, %v814_v19, 0 }
 0x245   : > { %2708 = vmatpush3.bf16.xpose.msra.mxu1 %v821_v20 }
 0x246   : > { %2713 = vmatprep.subr.bf16.mxu1 %v3189_v5 }
 0x24c   : > { %2710 = vmatmul.mubr.msk.bf16.vlgmr.msra.gmra.mrb[4].mxu1 %vm816_vm2, %v813_v17 }
 0x24d   : > { %2714 = vmatpush3.bf16.msra.mxu1 %v899_v24  ;;  %2715 = vmatprep.mubr.msk.bf16.mxu1 %vm3191_vm1, %v3189_v5 }
 0x24e   : > { %2719 = vmatprep.subr.bf16.mxu1 %v3189_v5 }
 0x31f   : > { %v857_v25 = vpop.f32.mrb[4].mxu1 }
 0x320   : > { %v864_v26 = vmul.f32 0.25, %v857_v25  ;;  %v2711_v27 = vpop.f32.mrb[5].mxu1 }
 0x321   : > { %v860_v28 = vpop.f32.mrb[6].mxu1 }
 0x322   : > { %v865_v29 = vmul.f32 0.25, %v860_v28  ;;  %v2712_v30 = vpop.f32.mrb[7].mxu1  ;;  %v867_v31 = vsel %vm866_vm5, %v864_v26, -inf }
 0x323   : > { %868 = vmax.xlane.f32.xlu0 %v867_v31 }
 0x324   : > { %v871_v32 = vsel %vm870_vm6, %v865_v29, -inf }
 0x325   : > { %872 = vmax.xlane.f32.xlu1 %v871_v32 }
 0x3b0   : > { %v869_v33 = vpop.xlane.xlu0 %868 }
 0x3b1   : > { %v874_v35 = vsub.f32 %v864_v26, %v869_v33 }
 0x3b2   : > { %v873_v36 = vpop.xlane.xlu1 %872 }
 0x3b3   : > { %v876_v37 = vmul.f32 1.442695, %v874_v35  ;;  %v875_v38 = vsub.f32 %v865_v29, %v873_v36 }
 0x3b5   : > { %3024 = vpow2.f32 %v876_v37  ;;  %v878_v39 = vmul.f32 1.442695, %v875_v38 }
 0x3b7   : > { %3026 = vpow2.f32 %v878_v39 }
 0x3bf   : > { %v3025_v40 = vpop.eup %3024 }
 0x3c0   : > { %v880_v41 = vsel %vm866_vm5, %v3025_v40, 0.0 }
 0x3c1   : > { %v3027_v42 = vpop.eup %3026  ;;  %881 = vadd.xlane.f32.xlu0 %v880_v41 }
 0x3c2   : > { %v883_v43 = vsel %vm870_vm6, %v3027_v42, 0.0 }
 0x3c3   : > { %884 = vadd.xlane.f32.xlu1 %v883_v43 }
 0x3d4   : > { %943 = vrot.lane.b32.xlu1 %v813_v17, %s3884_s27 }
 0x3d7   : > { %946 = vrot.lane.b32.xlu0 %v814_v19, %s3884_s27 }
 0x3d8   : > { %1072 = vrot.lane.b32.xlu1 %v814_v19, %s3194_s28 }
 0x3db   : > { %1197 = vrot.lane.b32.xlu0 %v814_v19, %s3195_s18 }
 0x3dc   : > { %1070 = vrot.lane.b32.xlu1 %v813_v17, %s3194_s28 }
 0x3df   : > { %1322 = vrot.lane.b32.xlu0 %v814_v19, %s3196_s29 }
 0x3e0   : > { %1195 = vrot.lane.b32.xlu1 %v813_v17, %s3195_s18 }
 0x3e3   : > { %1447 = vrot.lane.b32.xlu0 %v814_v19, %s3197_s20 }
 0x3e4   : > { %1320 = vrot.lane.b32.xlu1 %v813_v17, %s3196_s29 }
 0x3e7   : > { %1572 = vrot.lane.b32.xlu0 %v814_v19, %s3198_s19 }
 0x3e8   : > { %1445 = vrot.lane.b32.xlu1 %v813_v17, %s3197_s20 }
 0x3eb   : > { %1697 = vrot.lane.b32.xlu0 %v814_v19, %s3199_s24 }
 0x3ec   : > { %1570 = vrot.lane.b32.xlu1 %v813_v17, %s3198_s19 }
 0x3f0   : > { %1695 = vrot.lane.b32.xlu1 %v813_v17, %s3199_s24 }
 0x44e   : > { %v882_v44 = vpop.xlane.xlu0 %881 }
 0x44f   : > { %3028 = vrcp.f32 %v882_v44 }
 0x450   : > { %v885_v45 = vpop.xlane.xlu1 %884 }
 0x451   : > { %3030 = vrcp.f32 %v885_v45 }
 0x452   : > { %v947_v47 = vpop.permute.xlu0 %946 }
 0x453   : > { %v952_v56 = vsel %vm816_vm2, %v947_v47, 0 }
 0x454   : > { %v944_v46 = vpop.permute.xlu1 %943 }
 0x456   : > { %v1198_v54 = vpop.permute.xlu0 %1197 }
 0x457   : > { %v1203_v60 = vsel %vm816_vm2, %v1198_v54, 0 }
 0x458   : > { %v1073_v48 = vpop.permute.xlu1 %1072 }
 0x459   : > { %v3029_v49 = vpop.eup %3028  ;;  %v1078_v50 = vsel %vm816_vm2, %v1073_v48, 0 }
 0x45a   : > { %2732 = vmatpush3.bf16.xpose.msra.mxu0 %v1078_v50  ;;  %v888_v52 = vmul.f32 %v3029_v49, %v3025_v40  ;;  %v1323_v61 = vpop.permute.xlu0 %1322 }
 0x45b   : > { %v3031_v51 = vpop.eup %3030  ;;  %2743 = vmatprep.subr.bf16.mxu0 %v3189_v5  ;;  %v1328_v0 = vsel %vm816_vm2, %v1323_v61, 0 }
 0x45c   : > { %v889_v53 = vmul.f32 %v3031_v51, %v3027_v42  ;;  %v1071_v57 = vpop.permute.xlu1 %1070 }
 0x45e   : > { %v890_v55 = vpack.c.bf16 %v889_v53, %v888_v52  ;;  %v1448_v1 = vpop.permute.xlu0 %1447 }
 0x45f   : > { %v1453_v3 = vsel %vm816_vm2, %v1448_v1, 0 }
 0x460   : > { %2716 = vmatmul.mubr.msk.bf16.vlgmr.msra.gmra.mrb[8].mxu1 %vm866_vm5, %v890_v55  ;;  %v1196_v63 = vpop.permute.xlu1 %1195 }
 0x461   : > { %2720 = vmatpush3.bf16.xpose.msra.mxu1 %v952_v56  ;;  %2734 = vmatmul.mubr.msk.bf16.vlgmr.msra.gmra.mrb[4].mxu0 %vm816_vm2, %v1071_v57 }
 0x462   : > { %2744 = vmatpush3.bf16.xpose.msra.mxu0 %v1203_v60  ;;  %2721 = vmatprep.mubr.msk.bf16.mxu1 %vm3191_vm1, %v3189_v5  ;;  %v1573_v4 = vpop.permute.xlu0 %1572 }
 0x463   : > { %2745 = vmatprep.mubr.msk.bf16.mxu0 %vm3191_vm1, %v3189_v5  ;;  %2755 = vmatprep.subr.bf16.mxu0 %v3189_v5  ;;  %v1578_v7 = vsel %vm816_vm2, %v1573_v4, 0 }
 0x464   : > { %2725 = vmatprep.subr.bf16.mxu1 %v3189_v5  ;;  %v1321_v2 = vpop.permute.xlu1 %1320 }
 0x466   : > { %v1698_v8 = vpop.permute.xlu0 %1697 }
 0x467   : > { %v1703_v10 = vsel %vm816_vm2, %v1698_v8, 0 }
 0x468   : > { %2722 = vmatmul.mubr.msk.bf16.vlgmr.msra.gmra.mrb[12].mxu1 %vm816_vm2, %v944_v46  ;;  %v1446_v6 = vpop.permute.xlu1 %1445 }
 0x469   : > { %2746 = vmatmul.mubr.msk.bf16.vlgmr.msra.gmra.mrb[8].mxu0 %vm816_vm2, %v1196_v63  ;;  %2727 = vmatprep.mubr.msk.bf16.mxu1 %vm3191_vm1, %v3189_v5 }
 0x46a   : > { %2756 = vmatpush3.bf16.xpose.msra.mxu0 %v1328_v0  ;;  %2757 = vmatprep.mubr.msk.bf16.mxu0 %vm3191_vm1, %v3189_v5 }
 0x46b   : > { %2767 = vmatprep.subr.bf16.mxu0 %v3189_v5 }
 0x46c   : > { %v1571_v9 = vpop.permute.xlu1 %1570 }
 0x470   : > { %v1696_v11 = vpop.permute.xlu1 %1695 }
 0x471   : > { %2758 = vmatmul.mubr.msk.bf16.vlgmr.msra.gmra.mrb[12].mxu0 %vm816_vm2, %v1321_v2 }
 0x472   : > { %2768 = vmatpush3.bf16.xpose.msra.mxu0 %v1453_v3  ;;  %2769 = vmatprep.mubr.msk.bf16.mxu0 %vm3191_vm1, %v3189_v5 }
 0x473   : > { %2779 = vmatprep.subr.bf16.mxu0 %v3189_v5 }
 0x479   : > { %2770 = vmatmul.mubr.msk.bf16.vlgmr.msra.gmra.mrb[16].mxu0 %vm816_vm2, %v1446_v6 }
 0x47a   : > { %2780 = vmatpush3.bf16.xpose.msra.mxu0 %v1578_v7  ;;  %2781 = vmatprep.mubr.msk.bf16.mxu0 %vm3191_vm1, %v3189_v5 }
 0x47b   : > { %2791 = vmatprep.subr.bf16.mxu0 %v3189_v5 }
 0x481   : > { %2782 = vmatmul.mubr.msk.bf16.vlgmr.msra.gmra.mrb[20].mxu0 %vm816_vm2, %v1571_v9 }
 0x482   : > { %2792 = vmatpush3.bf16.xpose.msra.mxu0 %v1703_v10  ;;  %2793 = vmatprep.mubr.msk.bf16.mxu0 %vm3191_vm1, %v3189_v5 }
 0x483   : > { %2803 = vmatprep.subr.bf16.mxu0 %v3189_v5 }
 0x489   : > { %2794 = vmatmul.mubr.msk.bf16.vlgmr.msra.gmra.mrb[24].mxu0 %vm816_vm2, %v1696_v11 }
 0x48a   : > { %2819 = vmatprep.mubr.msk.bf16.mxu0 %vm3191_vm1, %v3189_v5 }
 0x533   : > { %v3508_v12 = vpop.f32.mrb[8].mxu1 }
 0x534   : > { %v2717_v13 = vpop.f32.mrb[9].mxu1  ;;  %v1114_v14 = vpop.f32.mrb[4].mxu0 }
 0x535   : > { %v3510_v15 = vmul.f32 0.25, %v1114_v14  ;;  %v3512_v16 = vpop.f32.mrb[10].mxu1  ;;  %v2735_v17 = vpop.f32.mrb[5].mxu0 }
 0x536   : > { %v2718_v19 = vpop.f32.mrb[11].mxu1  ;;  %v1117_v20 = vpop.f32.mrb[6].mxu0 }
 0x537   : > { %v3514_v21 = vmul.f32 0.25, %v1117_v20  ;;  %v2736_v22 = vpop.f32.mrb[7].mxu0  ;;  %v1123_v24 = vsel %vm866_vm5, %v3510_v15, -inf }
 0x538   : > { %1124 = vmax.xlane.f32.xlu0 %v1123_v24 }
 0x539   : > { %v1126_v26 = vsel %vm870_vm6, %v3514_v21, -inf }
 0x53b   : > { %v3518_v25 = vpop.f32.mrb[12].mxu1 }
 0x53c   : > { %1127 = vmax.xlane.f32.xlu0 %v1126_v26  ;;  %v2723_v27 = vpop.f32.mrb[13].mxu1  ;;  %v1239_v28 = vpop.f32.mrb[8].mxu0 }
 0x53d   : > { %v1246_v29 = vmul.f32 0.25, %v1239_v28  ;;  %v3522_v30 = vpop.f32.mrb[14].mxu1  ;;  %v2747_v31 = vpop.f32.mrb[9].mxu0 }
 0x53e   : > { %v2724_v32 = vpop.f32.mrb[15].mxu1  ;;  %v1242_v33 = vpop.f32.mrb[10].mxu0 }
 0x53f   : > { %v1247_v35 = vmul.f32 0.25, %v1242_v33  ;;  %v2748_v36 = vpop.f32.mrb[11].mxu0  ;;  %v1248_v37 = vsel %vm866_vm5, %v1246_v29, -inf  ;;  %v3563_v33 = vmul.f32 0.25, %v3518_v25 }
 0x540   : > { %1249 = vmax.xlane.f32.xlu0 %v1248_v37 }
 0x541   : > { %v1251_v38 = vsel %vm870_vm6, %v1247_v35, -inf  ;;  %v997_v25 = vsel %vm866_vm5, %v3563_v33, -inf }
 0x542   : > { %1252 = vmax.xlane.f32.xlu1 %v1251_v38 }
 0x544   : > { %v1364_v39 = vpop.f32.mrb[12].mxu0 }
 0x545   : > { %v3526_v40 = vmul.f32 0.25, %v1364_v39  ;;  %v2759_v41 = vpop.f32.mrb[13].mxu0 }
 0x546   : > { %v1367_v42 = vpop.f32.mrb[14].mxu0 }
 0x547   : > { %v3528_v43 = vmul.f32 0.25, %v1367_v42  ;;  %v2760_v44 = vpop.f32.mrb[15].mxu0  ;;  %v1373_v45 = vsel %vm866_vm5, %v3526_v40, -inf }
 0x548   : > { %1374 = vmax.xlane.f32.xlu0 %v1373_v45 }
 0x549   : > { %v1376_v46 = vsel %vm870_vm6, %v3528_v43, -inf }
 0x54a   : > { %1377 = vmax.xlane.f32.xlu1 %v1376_v46 }
 0x54c   : > { %v1489_v47 = vpop.f32.mrb[16].mxu0 }
 0x54d   : > { %v3534_v48 = vmul.f32 0.25, %v1489_v47  ;;  %v2771_v49 = vpop.f32.mrb[17].mxu0 }
 0x54e   : > { %v1492_v50 = vpop.f32.mrb[18].mxu0  ;;  %v3590_v49 = vmul.f32 0.25, %v3522_v30 }
 0x54f   : > { %v3536_v51 = vmul.f32 0.25, %v1492_v50  ;;  %v2772_v52 = vpop.f32.mrb[19].mxu0  ;;  %v1498_v53 = vsel %vm866_vm5, %v3534_v48, -inf }
 0x550   : > { %1499 = vmax.xlane.f32.xlu0 %v1498_v53  ;;  %v1000_v52 = vsel %vm870_vm6, %v3590_v49, -inf }
 0x551   : > { %v1501_v54 = vsel %vm870_vm6, %v3536_v51, -inf }
 0x552   : > { %1502 = vmax.xlane.f32.xlu1 %v1501_v54 }
 0x554   : > { %v1614_v55 = vpop.f32.mrb[20].mxu0 }
 0x555   : > { %v3542_v56 = vmul.f32 0.25, %v1614_v55  ;;  %v2783_v57 = vpop.f32.mrb[21].mxu0 }
 0x556   : > { %v1617_v60 = vpop.f32.mrb[22].mxu0 }
 0x557   : > { %v3544_v61 = vmul.f32 0.25, %v1617_v60  ;;  %v2784_v63 = vpop.f32.mrb[23].mxu0  ;;  %v1623_v0 = vsel %vm866_vm5, %v3542_v56, -inf }
 0x558   : > { %1624 = vmax.xlane.f32.xlu0 %v1623_v0 }
 0x559   : > { %v1626_v1 = vsel %vm870_vm6, %v3544_v61, -inf }
 0x55a   : > { %1627 = vmax.xlane.f32.xlu1 %v1626_v1 }
 0x55c   : > { %v1739_v2 = vpop.f32.mrb[24].mxu0 }
 0x55d   : > { %v3550_v3 = vmul.f32 0.25, %v1739_v2  ;;  %v2795_v4 = vpop.f32.mrb[25].mxu0 }
 0x55e   : > { %v1742_v6 = vpop.f32.mrb[26].mxu0 }
 0x55f   : > { %v3552_v7 = vmul.f32 0.25, %v1742_v6  ;;  %v2796_v8 = vpop.f32.mrb[27].mxu0  ;;  %v1748_v9 = vsel %vm866_vm5, %v3550_v3, -inf }
 0x560   : > { %1749 = vmax.xlane.f32.xlu0 %v1748_v9 }
 0x561   : > { %v1751_v10 = vsel %vm870_vm6, %v3552_v7, -inf }
 0x562   : > { %1752 = vmax.xlane.f32.xlu1 %v1751_v10 }
 0x5c5   : > { %v1125_v11 = vpop.xlane.xlu0 %1124 }
 0x5c6   : > { %v1129_v13 = vsub.f32 %v3510_v15, %v1125_v11 }
 0x5c8   : > { %v1131_v14 = vmul.f32 1.442695, %v1129_v13 }
 0x5c9   : > { %v1128_v17 = vpop.xlane.xlu0 %1127 }
 0x5ca   : > { %3032 = vpow2.f32 %v1131_v14  ;;  %v1130_v19 = vsub.f32 %v3514_v21, %v1128_v17 }
 0x5cc   : > { %v1133_v20 = vmul.f32 1.442695, %v1130_v19 }
 0x5cd   : > { %v1250_v22 = vpop.xlane.xlu0 %1249 }
 0x5ce   : > { %3034 = vpow2.f32 %v1133_v20  ;;  %v1254_v24 = vsub.f32 %v1246_v29, %v1250_v22 }
 0x5cf   : > { %v1253_v26 = vpop.xlane.xlu1 %1252 }
 0x5d0   : > { %v1256_v27 = vmul.f32 1.442695, %v1254_v24  ;;  %v1255_v28 = vsub.f32 %v1247_v35, %v1253_v26 }
 0x5d2   : > { %3036 = vpow2.f32 %v1256_v27  ;;  %v1258_v31 = vmul.f32 1.442695, %v1255_v28 }
 0x5d4   : > { %v3560_v32 = vpop.eup %3032  ;;  %3038 = vpow2.f32 %v1258_v31 }
 0x5d5   : > { %v1375_v15 = vpop.xlane.xlu0 %1374  ;;  %v1135_v36 = vsel %vm866_vm5, %v3560_v32, 0.0 }
 0x5d6   : > { %v1379_v21 = vsub.f32 %v3526_v40, %v1375_v15  ;;  %1136 = vadd.xlane.f32.xlu0 %v1135_v36 }
 0x5d7   : > { %v1378_v37 = vpop.xlane.xlu1 %1377 }
 0x5d8   : > { %v3568_v29 = vpop.eup %3034  ;;  %v1381_v38 = vmul.f32 1.442695, %v1379_v21  ;;  %v1380_v35 = vsub.f32 %v3528_v43, %v1378_v37 }
 0x5d9   : > { %v1138_v39 = vsel %vm870_vm6, %v3568_v29, 0.0 }
 0x5da   : > { %3040 = vpow2.f32 %v1381_v38  ;;  %v1383_v41 = vmul.f32 1.442695, %v1380_v35  ;;  %1139 = vadd.xlane.f32.xlu1 %v1138_v39  ;;  %998 = vmax.xlane.f32.xlu0 %v997_v25 }
 0x5dc   : > { %v3575_v42 = vpop.eup %3036  ;;  %3042 = vpow2.f32 %v1383_v41 }
 0x5dd   : > { %v1260_v40 = vsel %vm866_vm5, %v3575_v42, 0.0  ;;  %v1500_v53 = vpop.xlane.xlu0 %1499 }
 0x5de   : > { %v3579_v44 = vpop.eup %3038  ;;  %1261 = vadd.xlane.f32.xlu0 %v1260_v40  ;;  %v1504_v54 = vsub.f32 %v3534_v48, %v1500_v53 }
 0x5df   : > { %v1263_v43 = vsel %vm870_vm6, %v3579_v44, 0.0  ;;  %v1503_v30 = vpop.xlane.xlu1 %1502 }
 0x5e0   : > { %1264 = vadd.xlane.f32.xlu1 %v1263_v43  ;;  %v1506_v55 = vmul.f32 1.442695, %v1504_v54  ;;  %v1505_v57 = vsub.f32 %v3536_v51, %v1503_v30 }
 0x5e2   : > { %3044 = vpow2.f32 %v1506_v55  ;;  %v1508_v0 = vmul.f32 1.442695, %v1505_v57 }
 0x5e4   : > { %v3583_v45 = vpop.eup %3040  ;;  %3046 = vpow2.f32 %v1508_v0 }
 0x5e5   : > { %v1385_v46 = vsel %vm866_vm5, %v3583_v45, 0.0  ;;  %v1625_v60 = vpop.xlane.xlu0 %1624 }
 0x5e6   : > { %v3587_v47 = vpop.eup %3042  ;;  %1386 = vadd.xlane.f32.xlu1 %v1385_v46  ;;  %v1629_v1 = vsub.f32 %v3542_v56, %v1625_v60 }
 0x5e7   : > { %v1388_v50 = vsel %vm870_vm6, %v3587_v47, 0.0  ;;  %v1628_v2 = vpop.xlane.xlu1 %1627 }
 0x5e8   : > { %v1631_v48 = vmul.f32 1.442695, %v1629_v1  ;;  %v1630_v6 = vsub.f32 %v3544_v61, %v1628_v2 }
 0x5ea   : > { %1389 = vadd.xlane.f32.xlu1 %v1388_v50  ;;  %3048 = vpow2.f32 %v1631_v48  ;;  %v1633_v8 = vmul.f32 1.442695, %v1630_v6 }
 0x5ec   : > { %v3602_v63 = vpop.eup %3044  ;;  %3050 = vpow2.f32 %v1633_v8 }
 0x5ed   : > { %v1510_v4 = vsel %vm866_vm5, %v3602_v63, 0.0  ;;  %v1750_v13 = vpop.xlane.xlu0 %1749 }
 0x5ee   : > { %1001 = vmax.xlane.f32.xlu1 %v1000_v52  ;;  %v3608_v9 = vpop.eup %3046 }
 0x5ef   : > { %v1513_v51 = vsel %vm870_vm6, %v3608_v9, 0.0  ;;  %v1753_v14 = vpop.xlane.xlu1 %1752 }
 0x5f4   : > { %1021 = vrot.lane.b32.xlu0 %v3440_v18, %s3884_s27  ;;  %v3612_v10 = vpop.eup %3048  ;;  %s3701_s27 = scalar_lea.vmem %s3867_s6, %s2612_s26 }
 0x5f5   : > { %v1635_v56 = vsel %vm866_vm5, %v3612_v10, 0.0 }
 0x5f6   : > { %v3616_v11 = vpop.eup %3050 }
 0x5f7   : > { %v1638_v61 = vsel %vm870_vm6, %v3616_v11, 0.0 }
 0x5ff   : > { %1146 = vrot.lane.b32.xlu1 %v3440_v18, %s3194_s28 }
 0x613   : > { %1511 = vadd.xlane.f32.xlu0 %v1510_v4 }
 0x623   : > { %1514 = vadd.xlane.f32.xlu1 %v1513_v51 }
 0x627   : > { %1636 = vadd.xlane.f32.xlu1 %v1635_v56 }
 0x62b   : > { %1639 = vadd.xlane.f32.xlu1 %v1638_v61 }
 0x663   : > { %v1137_v17 = vpop.xlane.xlu0 %1136 }
 0x664   : > { %3052 = vrcp.f32 %v1137_v17 }
 0x667   : > { %v1140_v19 = vpop.xlane.xlu1 %1139  ;;  %v999_v20 = vpop.xlane.xlu0 %998 }
 0x668   : > { %3054 = vrcp.f32 %v1140_v19  ;;  %v1003_v22 = vsub.f32 %v3563_v33, %v999_v20 }
 0x66a   : > { %v1005_v24 = vmul.f32 1.442695, %v1003_v22 }
 0x66b   : > { %v1262_v26 = vpop.xlane.xlu0 %1261 }
 0x66c   : > { %3056 = vpow2.f32 %v1005_v24 }
 0x66d   : > { %3058 = vrcp.f32 %v1262_v26  ;;  %v1265_v27 = vpop.xlane.xlu1 %1264 }
 0x66e   : > { %3060 = vrcp.f32 %v1265_v27  ;;  %v3053_v31 = vpop.eup %3052 }
 0x66f   : > { %v1022_v28 = vpop.permute.xlu0 %1021  ;;  %v3623_v21 = vmul.f32 %v3053_v31, %v3560_v32 }
 0x670   : > { %v1027_v15 = vand.u32 %v1022_v28, %v3444_v23 }
 0x672   : > { %v3055_v36 = vpop.eup %3054  ;;  %2726 = vmatpush3.bf16.msra.mxu1 %v1027_v15 }
 0x673   : > { %v3626_v37 = vmul.f32 %v3055_v36, %v3568_v29  ;;  %v1387_v38 = vpop.xlane.xlu1 %1386  ;;  %2737 = vmatprep.subr.bf16.mxu1 %v3189_v5 }
 0x674   : > { %3062 = vrcp.f32 %v1387_v38 }
 0x675   : > { %v1145_v33 = vpack.c.bf16 %v3626_v37, %v3623_v21 }
 0x676   : > { %v3057_v35 = vpop.eup %3056 }
 0x677   : > { %v3059_v39 = vpop.eup %3058  ;;  %v1390_v25 = vpop.xlane.xlu1 %1389  ;;  %v1009_v41 = vsel %vm866_vm5, %v3057_v35, 0.0 }
 0x678   : > { %v3061_v40 = vpop.eup %3060  ;;  %3064 = vrcp.f32 %v1390_v25  ;;  %1010 = vadd.xlane.f32.xlu0 %v1009_v41  ;;  %v1268_v32 = vmul.f32 %v3059_v39, %v3575_v42  ;;  %v1754_v42 = vsub.f32 %v3550_v3, %v1750_v13 }
 0x679   : > { %v1269_v29 = vmul.f32 %v3061_v40, %v3579_v44 }
 0x67a   : > { %v1756_v44 = vmul.f32 1.442695, %v1754_v42 }
 0x67b   : > { %v1002_v43 = vpop.xlane.xlu1 %1001  ;;  %v1270_v46 = vpack.c.bf16 %v1269_v29, %v1268_v32 }
 0x67c   : > { %v1004_v50 = vsub.f32 %v3590_v49, %v1002_v43 }
 0x67e   : > { %v1007_v52 = vmul.f32 1.442695, %v1004_v50  ;;  %v3063_v53 = vpop.eup %3062 }
 0x67f   : > { %v1393_v55 = vmul.f32 %v3063_v53, %v3583_v45  ;;  %v1755_v45 = vsub.f32 %v3552_v7, %v1753_v14  ;;  %v1147_v7 = vpop.permute.xlu1 %1146 }
 0x680   : > { %3066 = vpow2.f32 %v1007_v52  ;;  %v1152_v20 = vand.u32 %v1147_v7, %v3444_v23 }
 0x681   : > { %3068 = vpow2.f32 %v1756_v44  ;;  %v1758_v1 = vmul.f32 1.442695, %v1755_v45 }
 0x682   : > { %v3065_v54 = vpop.eup %3064 }
 0x683   : > { %v1394_v30 = vmul.f32 %v3065_v54, %v3587_v47  ;;  %3070 = vpow2.f32 %v1758_v1  ;;  %v2972_v1 = vld [vmem:[%s3701_s27] sm:$0xff]  }
 0x684   : > { %2804 = vmatpush3.bf16.msra.mxu0 %v2972_v1 }
 0x685   : > { %v1395_v57 = vpack.c.bf16 %v1394_v30, %v1393_v55  ;;  %2805 = vmatprep.subr.bf16.mxu0 %v3189_v5 }
 0x68a   : > { %v3067_v60 = vpop.eup %3066 }
 0x68b   : > { %v1012_v0 = vsel %vm870_vm6, %v3067_v60, 0.0  ;;  %v3643_v49 = vpop.eup %3068 }
 0x68c   : > { %1013 = vadd.xlane.f32.xlu1 %v1012_v0  ;;  %v1760_v47 = vsel %vm866_vm5, %v3643_v49, 0.0 }
 0x68d   : > { %v3648_v2 = vpop.eup %3070 }
 0x68e   : > { %1271 = vrot.lane.b32.xlu0 %v3440_v18, %s3195_s18  ;;  %v1763_v3 = vsel %vm870_vm6, %v3648_v2, 0.0 }
 0x69d   : > { %1396 = vrot.lane.b32.xlu1 %v3440_v18, %s3196_s29 }
 0x6a0   : > { %v1512_v6 = vpop.xlane.xlu0 %1511 }
 0x6ad   : > { %1761 = vadd.xlane.f32.xlu0 %v1760_v47 }
 0x6b0   : > { %v1515_v4 = vpop.xlane.xlu1 %1514 }
 0x6b4   : > { %v1637_v48 = vpop.xlane.xlu1 %1636 }
 0x6b8   : > { %v1640_v8 = vpop.xlane.xlu1 %1639 }
 0x6c1   : > { %1764 = vadd.xlane.f32.xlu1 %v1763_v3  ;;  %v2973_v3 = vld [vmem:[%s3701_s27 + $0x8] sm:$0xff]  }
 0x6c2   : > { %2806 = vmatpush3.bf16.msra.mxu0 %v2973_v3 }
 0x6c3   : > { %1521 = vrot.lane.b32.xlu0 %v3440_v18, %s3197_s20  ;;  %2807 = vmatprep.subr.bf16.mxu0 %v3189_v5 }
 0x6c7   : > { %1771 = vrot.lane.b32.xlu0 %v3440_v18, %s3199_s24 }
 0x6d2   : > { %1646 = vrot.lane.b32.xlu1 %v3440_v18, %s3198_s19 }
 0x705   : > { %v1011_v51 = vpop.xlane.xlu0 %1010 }
 0x706   : > { %3072 = vrcp.f32 %v1011_v51  ;;  %v2975_v51 = vld [vmem:[%s3701_s27 + $0x18] sm:$0xff]  }
 0x709   : > { %v1272_v18 = vpop.permute.xlu0 %1271 }
 0x70a   : > { %v1277_v22 = vand.u32 %v1272_v18, %v3444_v23  ;;  %v2978_v18 = vld [vmem:[%s3701_s27 + $0x30] sm:$0xff]  }
 0x710   : > { %v3073_v61 = vpop.eup %3072 }
 0x711   : > { %v1017_v14 = vmul.f32 %v3073_v61, %v3057_v35 }
 0x719   : > { %v1014_v56 = vpop.xlane.xlu1 %1013 }
 0x71a   : > { %3074 = vrcp.f32 %v1014_v56 }
 0x71b   : > { %3076 = vrcp.f32 %v1515_v4 }
 0x71c   : > { %3078 = vrcp.f32 %v1512_v6 }
 0x71d   : > { %v1397_v24 = vpop.permute.xlu1 %1396  ;;  %3080 = vrcp.f32 %v1640_v8 }
 0x71e   : > { %v1402_v26 = vand.u32 %v1397_v24, %v3444_v23  ;;  %3082 = vrcp.f32 %v1637_v48  ;;  %v2974_v48 = vld [vmem:[%s3701_s27 + $0x10] sm:$0xff]  }
 0x71f   : > { %2808 = vmatpush3.bf16.msra.mxu0 %v2974_v48 }
 0x720   : > { %2809 = vmatprep.subr.bf16.mxu0 %v3189_v5 }
 0x723   : > { %2810 = vmatpush3.bf16.msra.mxu0 %v2975_v51  ;;  %v3090_v51 = vld [vmem:[#allocation2] sm:$0xff] }
 0x724   : > { %v3075_v13 = vpop.eup %3074  ;;  %2811 = vmatprep.subr.bf16.mxu0 %v3189_v5 }
 0x725   : > { %v1018_v17 = vmul.f32 %v3075_v13, %v3067_v60  ;;  %v3077_v15 = vpop.eup %3076 }
 0x726   : > { %v3079_v36 = vpop.eup %3078  ;;  %v1519_v21 = vmul.f32 %v3077_v15, %v3608_v9 }
 0x727   : > { %v1019_v19 = vpack.c.bf16 %v1018_v17, %v1017_v14  ;;  %v1518_v37 = vmul.f32 %v3079_v36, %v3602_v63  ;;  %v3081_v35 = vpop.eup %3080  ;;  %v2976_v14 = vld [vmem:[%s3701_s27 + $0x20] sm:$0xff]  }
 0x728   : > { %v3083_v39 = vpop.eup %3082  ;;  %v1644_v25 = vmul.f32 %v3081_v35, %v3616_v11  ;;  %2812 = vmatpush3.bf16.msra.mxu0 %v2976_v14 }
 0x729   : > { %2728 = vmatmul.mubr.msk.bf16.vlgmr.msra.gmra.mrb[16].mxu1 %vm866_vm5, %v1019_v19  ;;  %v1520_v38 = vpack.c.bf16 %v1519_v21, %v1518_v37  ;;  %v1643_v63 = vmul.f32 %v3083_v39, %v3612_v10  ;;  %2813 = vmatprep.subr.bf16.mxu0 %v3189_v5 }
 0x72a   : > { %2738 = vmatpush3.bf16.msra.mxu1 %v1152_v20  ;;  %2739 = vmatprep.mubr.msk.bf16.mxu1 %vm3191_vm1, %v3189_v5  ;;  %v2977_v20 = vld [vmem:[%s3701_s27 + $0x28] sm:$0xff]  }
 0x72b   : > { %2749 = vmatprep.subr.bf16.mxu1 %v3189_v5  ;;  %v1645_v32 = vpack.c.bf16 %v1644_v25, %v1643_v63 }
 0x72c   : > { %2814 = vmatpush3.bf16.msra.mxu0 %v2977_v20 }
 0x72d   : > { %2815 = vmatprep.subr.bf16.mxu0 %v3189_v5 }
 0x730   : > { %2816 = vmatpush3.bf16.msra.mxu0 %v2978_v18 }
 0x731   : > { %2740 = vmatmul.mubr.msk.bf16.vlgmr.msra.gmra.mrb[20].mxu1 %vm866_vm5, %v1145_v33  ;;  %2817 = vmatprep.subr.bf16.mxu0 %v3189_v5 }
 0x732   : > { %2750 = vmatpush3.bf16.msra.mxu1 %v1277_v22  ;;  %2751 = vmatprep.mubr.msk.bf16.mxu1 %vm3191_vm1, %v3189_v5 }
 0x733   : > { %2761 = vmatprep.subr.bf16.mxu1 %v3189_v5 }
 0x739   : > { %2752 = vmatmul.mubr.msk.bf16.vlgmr.msra.gmra.mrb[24].mxu1 %vm866_vm5, %v1270_v46 }
 0x73a   : > { %2762 = vmatpush3.bf16.msra.mxu1 %v1402_v26  ;;  %v1762_v27 = vpop.xlane.xlu0 %1761  ;;  %2763 = vmatprep.mubr.msk.bf16.mxu1 %vm3191_vm1, %v3189_v5  ;;  %v2979_v26 = vld [vmem:[%s3701_s27 + $0x38] sm:$0xff]  }
 0x73b   : > { %2773 = vmatprep.subr.bf16.mxu1 %v3189_v5  ;;  %3084 = vrcp.f32 %v1762_v27  ;;  %2818 = vmatpush3.bf16.msra.mxu0 %v2979_v26 }
 0x73e   : > { %v1522_v28 = vpop.permute.xlu0 %1521 }
 0x73f   : > { %v1527_v31 = vand.u32 %v1522_v28, %v3444_v23 }
 0x741   : > { %2764 = vmatmul.mubr.msk.bf16.vlgmr.msra.gmra.mrb[28].mxu1 %vm866_vm5, %v1395_v57 }
 0x742   : > { %2774 = vmatpush3.bf16.msra.mxu1 %v1527_v31  ;;  %2775 = vmatprep.mubr.msk.bf16.mxu1 %vm3191_vm1, %v3189_v5  ;;  %v1772_v40 = vpop.permute.xlu0 %1771 }
 0x743   : > { %2785 = vmatprep.subr.bf16.mxu1 %v3189_v5  ;;  %v1777_v29 = vand.u32 %v1772_v40, %v3444_v23 }
 0x745   : > { %v3085_v43 = vpop.eup %3084 }
 0x746   : > { %v1768_v50 = vmul.f32 %v3085_v43, %v3643_v49 }
 0x749   : > { %2776 = vmatmul.mubr.msk.bf16.vlgmr.msra.gmra.mrb[32].mxu1 %vm866_vm5, %v1520_v38 }
 0x74a   : > { %2787 = vmatprep.mubr.msk.bf16.mxu1 %vm3191_vm1, %v3189_v5 }
 0x74e   : > { %v1765_v33 = vpop.xlane.xlu1 %1764 }
 0x74f   : > { %3086 = vrcp.f32 %v1765_v33 }
 0x752   : > { %v1647_v9 = vpop.permute.xlu1 %1646 }
 0x753   : > { %v1652_v41 = vand.u32 %v1647_v9, %v3444_v23 }
 0x755   : > { %2786 = vmatpush3.bf16.msra.mxu1 %v1652_v41 }
 0x756   : > { %2797 = vmatprep.subr.bf16.mxu1 %v3189_v5 }
 0x758   : > { %2788 = vmatmul.mubr.msk.bf16.vlgmr.msra.gmra.mrb[36].mxu1 %vm866_vm5, %v1645_v32 }
 0x759   : > { %v3087_v46 = vpop.eup %3086  ;;  %2798 = vmatpush3.bf16.msra.mxu1 %v1777_v29  ;;  %2799 = vmatprep.mubr.msk.bf16.mxu1 %vm3191_vm1, %v3189_v5 }
 0x75a   : > { %v1769_v11 = vmul.f32 %v3087_v46, %v3648_v2 }
 0x75c   : > { %v1770_v10 = vpack.c.bf16 %v1769_v11, %v1768_v50 }
 0x760   : > { %2800 = vmatmul.mubr.msk.bf16.vlgmr.msra.gmra.mrb[40].mxu1 %vm866_vm5, %v1770_v10 }
 0x761   : > { %2170 = vmatprep.mubr.bf16.mxu1 %v3190_v34 }
 0x7fc   : > { %v1063_v52 = vpop.f32.mrb[16].mxu1 }
 0x7fd   : > { %v2729_v23 = vpop.f32.mrb[17].mxu1 }
 0x7fe   : > { %v1066_v53 = vpop.f32.mrb[18].mxu1 }
 0x7ff   : > { %v2905_v54 = vpack.i.bf16 %v1066_v53, %v1063_v52  ;;  %v2730_v55 = vpop.f32.mrb[19].mxu1 }
 0x801   : > { %2906 = vrot.lane.b32.xlu0 %v2905_v54, %s3199_s24 }
 0x804   : > { %v1188_v30 = vpop.f32.mrb[20].mxu1 }
 0x805   : > { %v2741_v57 = vpop.f32.mrb[21].mxu1 }
 0x806   : > { %v1191_v60 = vpop.f32.mrb[22].mxu1 }
 0x807   : > { %v2910_v0 = vpack.i.bf16 %v1191_v60, %v1188_v30  ;;  %v2742_v42 = vpop.f32.mrb[23].mxu1 }
 0x809   : > { %2911 = vrot.lane.b32.xlu0 %v2910_v0, %s3198_s19 }
 0x80c   : > { %v1313_v44 = vpop.f32.mrb[24].mxu1 }
 0x80d   : > { %v2753_v49 = vpop.f32.mrb[25].mxu1 }
 0x80e   : > { %v1316_v45 = vpop.f32.mrb[26].mxu1 }
 0x80f   : > { %v2915_v34 = vpack.i.bf16 %v1316_v45, %v1313_v44  ;;  %v2754_v47 = vpop.f32.mrb[27].mxu1 }
 0x811   : > { %2916 = vrot.lane.b32.xlu1 %v2915_v34, %s3197_s20 }
 0x814   : > { %v1438_v2 = vpop.f32.mrb[28].mxu1 }
 0x815   : > { %v2765_v7 = vpop.f32.mrb[29].mxu1 }
 0x816   : > { %v1441_v4 = vpop.f32.mrb[30].mxu1 }
 0x817   : > { %v2920_v6 = vpack.i.bf16 %v1441_v4, %v1438_v2  ;;  %v2766_v8 = vpop.f32.mrb[31].mxu1 }
 0x819   : > { %2921 = vrot.lane.b32.xlu0 %v2920_v6, %s3196_s29 }
 0x81c   : > { %v1563_v56 = vpop.f32.mrb[32].mxu1 }
 0x81d   : > { %v2777_v61 = vpop.f32.mrb[33].mxu1 }
 0x81e   : > { %v1566_v13 = vpop.f32.mrb[34].mxu1 }
 0x81f   : > { %v2925_v17 = vpack.i.bf16 %v1566_v13, %v1563_v56  ;;  %v2778_v19 = vpop.f32.mrb[35].mxu1 }
 0x821   : > { %2926 = vrot.lane.b32.xlu1 %v2925_v17, %s3195_s18  ;;  %s2613_s18 = sshll.u32 %s3171_s16, 7 }
 0x822   : > { %s3744_s19 = scalar_lea.vmem %s3869_s8, %s2613_s18 }
 0x823   : > { %v2980_v13 = vld [vmem:[%s3744_s19] ss:$8 sps:$4 sm:$0xff]   ;;  %v2982_v14 = vld [vmem:[%s3744_s19 + $0x4] ss:$8 sps:$4 sm:$0xff]   ;;  %v2985_v17 = vld [vmem:[%s3744_s19 + $0x14] ss:$8 sps:$4 sm:$0xff]  }
 0x824   : > { %2138 = vmatprep.subr.bf16.mxu1 %v2982_v14  ;;  %v2983_v19 = vld [vmem:[%s3744_s19 + $0x10] ss:$8 sps:$4 sm:$0xff]   ;;  %v2988_v20 = vld [vmem:[%s3744_s19 + $0x24] ss:$8 sps:$4 sm:$0xff]   ;;  %v2986_v18 = vld [vmem:[%s3744_s19 + $0x20] ss:$8 sps:$4 sm:$0xff]  }
 0x825   : > { %2139 = vmatpush1.bf16.msra.mxu1 %v2980_v13 }
 0x826   : > { %2140 = vmatprep.subr.bf16.mxu1 %v2985_v17 }
 0x829   : > { %2141 = vmatpush1.bf16.msra.mxu1 %v2983_v19 }
 0x82a   : > { %2142 = vmatprep.subr.bf16.mxu1 %v2988_v20 }
 0x82b   : > { %v1688_v22 = vpop.f32.mrb[36].mxu1 }
 0x82c   : > { %v2789_v24 = vpop.f32.mrb[37].mxu1 }
 0x82d   : > { %v1691_v27 = vpop.f32.mrb[38].mxu1  ;;  %v2989_v24 = vld [vmem:[%s3744_s19 + $0x30] ss:$8 sps:$4 sm:$0xff]   ;;  %2143 = vmatpush1.bf16.msra.mxu1 %v2986_v18 }
 0x82e   : > { %v2930_v28 = vpack.i.bf16 %v1691_v27, %v1688_v22  ;;  %v2790_v31 = vpop.f32.mrb[39].mxu1  ;;  %v2991_v22 = vld [vmem:[%s3744_s19 + $0x34] ss:$8 sps:$4 sm:$0xff]  }
 0x82f   : > { %2144 = vmatprep.subr.bf16.mxu1 %v2991_v22 }
 0x830   : > { %2931 = vrot.lane.b32.xlu0 %v2930_v28, %s3194_s28  ;;  %s1916_s28 = scalar_lea.vmem %s3868_s7, %s3171_s16 }
 0x831   : > { %v2558_v7 = vld [vmem:[%s1916_s28] ss:$0 sm:$0xff]  ;;  %2145 = vmatpush1.bf16.msra.mxu1 %v2989_v24 }
 0x833   : > { %v1813_v15 = vpop.f32.mrb[40].mxu1 }
 0x834   : > { %v2801_v36 = vpop.f32.mrb[41].mxu1 }
 0x835   : > { %v1816_v21 = vpop.f32.mrb[42].mxu1  ;;  %v2992_v36 = vld [vmem:[%s3744_s19 + $0x40] ss:$8 sps:$4 sm:$0xff]  }
 0x836   : > { %v2935_v37 = vpack.i.bf16 %v1816_v21, %v1813_v15  ;;  %v2802_v38 = vpop.f32.mrb[43].mxu1  ;;  %v2994_v15 = vld [vmem:[%s3744_s19 + $0x44] ss:$8 sps:$4 sm:$0xff]   ;;  %v2997_v21 = vld [vmem:[%s3744_s19 + $0x54] ss:$8 sps:$4 sm:$0xff]  }
 0x837   : > { %2146 = vmatprep.subr.bf16.mxu1 %v2994_v15  ;;  %v3000_v38 = vld [vmem:[%s3744_s19 + $0x64] ss:$8 sps:$4 sm:$0xff]  }
 0x838   : > { %2936 = vrot.lane.b32.xlu1 %v2935_v37, %s3897_s21  ;;  %s3755_s21 = scalar_lea.vmem %s3871_s10, %s2613_s18  ;;  %2147 = vmatpush1.bf16.msra.mxu1 %v2992_v36  ;;  %v2995_v37 = vld [vmem:[%s3744_s19 + $0x50] ss:$8 sps:$4 sm:$0xff]   ;;  %s2045_s18 = scalar_lea.vmem %s3870_s9, %s2569_s22 }
 0x839   : > { %2148 = vmatprep.subr.bf16.mxu1 %v2997_v21  ;;  %s3898_s22 = scalar_lea.vmem (!%p2604_p0), [#allocation3], %s3349_s23 }
 0x83c   : > { %2149 = vmatpush1.bf16.msra.mxu1 %v2995_v37 }
 0x83d   : > { %2150 = vmatprep.subr.bf16.mxu1 %v3000_v38 }
 0x873   : > { %v2907_v33 = vpop.permute.xlu0 %2906 }
 0x874   : > { %v2909_v5 = vunpack.i.h.bf16 %v2907_v33  ;;  %v2908_v9 = vunpack.i.l.bf16 %v2907_v33  ;;  %v2998_v33 = vld [vmem:[%s3744_s19 + $0x60] ss:$8 sps:$4 sm:$0xff]  }
 0x875   : > { %2151 = vmatpush1.bf16.msra.mxu1 %v2998_v33 }
 0x876   : > { %v1877_v50 = vsel %vm816_vm2, %v3512_v16, %v2909_v5  ;;  %v1876_v10 = vsel %vm816_vm2, %v3508_v12, %v2908_v9  ;;  %v3005_v5 = vld [vmem:[%s3755_s21] sm:$0xff]   ;;  %v3006_v9 = vld [vmem:[%s3755_s21 + $0x48] sm:$0xff]  }
 0x87b   : > { %v2912_v35 = vpop.permute.xlu0 %2911 }
 0x87c   : > { %v2914_v41 = vunpack.i.h.bf16 %v2912_v35  ;;  %v2913_v63 = vunpack.i.l.bf16 %v2912_v35  ;;  %v3003_v35 = vld [vmem:[%s3744_s19 + $0x74] ss:$8 sps:$4 sm:$0xff]  }
 0x87d   : > { %2152 = vmatprep.subr.bf16.mxu1 %v3003_v35 }
 0x87e   : > { %v1880_v53 = vsel %vm1878_vm7, %v1877_v50, %v2914_v41  ;;  %v1879_v54 = vsel %vm1878_vm7, %v1876_v10, %v2913_v63  ;;  %v3007_v41 = vld [vmem:[%s3755_s21 + $0x8] sm:$0xff]   ;;  %v3008_v63 = vld [vmem:[%s3755_s21 + $0x50] sm:$0xff]  }
 0x87f   : > { %v3015_v50 = vld [vmem:[%s3755_s21 + $0x28] sm:$0xff]  }
 0x883   : > { %v2917_v39 = vpop.permute.xlu1 %2916 }
 0x884   : > { %v2919_v32 = vunpack.i.h.bf16 %v2917_v39  ;;  %v2918_v29 = vunpack.i.l.bf16 %v2917_v39  ;;  %v3001_v39 = vld [vmem:[%s3744_s19 + $0x70] ss:$8 sps:$4 sm:$0xff]   ;;  %s2217_s19 = scalar_lea.vmem %s3872_s11, %s3171_s16 }
 0x885   : > { %2153 = vmatpush1.bf16.msra.mxu1 %v3001_v39 }
 0x886   : > { %v1883_v57 = vsel %vm1881_vm8, %v1880_v53, %v2919_v32  ;;  %v1882_v60 = vsel %vm1881_vm8, %v1879_v54, %v2918_v29  ;;  %v3010_v32 = vld [vmem:[%s3755_s21 + $0x58] sm:$0xff]  }
 0x887   : > { %v3011_v29 = vld [vmem:[%s3755_s21 + $0x18] sm:$0xff]  }
 0x88b   : > { %v2922_v25 = vpop.permute.xlu0 %2921 }
 0x88c   : > { %v2924_v46 = vunpack.i.h.bf16 %v2922_v25  ;;  %v2923_v11 = vunpack.i.l.bf16 %v2922_v25  ;;  %v3004_v25 = vld [vmem:[%s3755_s21 + $0x40] sm:$0xff]  }
 0x88d   : > { %2665 = vmatprep.subr.bf16.mxu0 %v3004_v25 }
 0x88e   : > { %v1886_v0 = vsel %vm1884_vm9, %v1883_v57, %v2924_v46  ;;  %v1885_v42 = vsel %vm1884_vm9, %v1882_v60, %v2923_v11  ;;  %v3013_v46 = vld [vmem:[%s3755_s21 + $0x20] sm:$0xff]   ;;  %v3014_v11 = vld [vmem:[%s3755_s21 + $0x68] sm:$0xff]   ;;  %v3017_v57 = vld [vmem:[%s3755_s21 + $0x30] sm:$0xff]  }
 0x88f   : > { %v3018_v60 = vld [vmem:[%s3755_s21 + $0x78] sm:$0xff]  }
 0x893   : > { %v2927_v40 = vpop.permute.xlu1 %2926 }
 0x894   : > { %v2929_v52 = vunpack.i.h.bf16 %v2927_v40  ;;  %v2928_v23 = vunpack.i.l.bf16 %v2927_v40  ;;  %v3009_v40 = vld [vmem:[%s3755_s21 + $0x10] sm:$0xff]  }
 0x896   : > { %v1889_v12 = vsel %vm1887_vm10, %v1886_v0, %v2929_v52  ;;  %v1888_v44 = vsel %vm1887_vm10, %v1885_v42, %v2928_v23  ;;  %v3019_v0 = vld [vmem:[%s3755_s21 + $0x38] sm:$0xff]   ;;  %v2046_v42 = vld [vmem:[%s2045_s18] sm:$0x3] }
 0x8a2   : > { %v2932_v43 = vpop.permute.xlu0 %2931 }
 0x8a3   : > { %v2934_v55 = vunpack.i.h.bf16 %v2932_v43  ;;  %v2933_v30 = vunpack.i.l.bf16 %v2932_v43  ;;  %v3012_v43 = vld [vmem:[%s3755_s21 + $0x60] sm:$0xff]  }
 0x8a5   : > { %v1892_v34 = vsel %vm1890_vm11, %v1889_v12, %v2934_v55  ;;  %v1891_v47 = vsel %vm1890_vm11, %v1888_v44, %v2933_v30  ;;  %v3016_v30 = vld [vmem:[%s3755_s21 + $0x70] sm:$0xff]   ;;  %v2055_v12 = vrot.slane %v2046_v42, %v592_v62 }
 0x8aa   : > { %v2937_v16 = vpop.permute.xlu1 %2936 }
 0x8ab   : > { %v2939_v49 = vunpack.i.h.bf16 %v2937_v16  ;;  %v2938_v45 = vunpack.i.l.bf16 %v2937_v16  ;;  %v2051_v16 = vrot.slane %v2046_v42, %v588_v59 }
 0x8ad   : > { %v1895_v1 = vsel %vm1893_vm12, %v1892_v34, %v2939_v49  ;;  %v1894_v2 = vsel %vm1893_vm12, %v1891_v47, %v2938_v45 }
 0x8ae   : > { %v1896_v3 = vpack.c.bf16 %v1895_v1, %v1894_v2 }
 0x8b0   : > { %2820 = vmatmul.mubr.bf16.vlgmr.msra.gmra.mrb[28].mxu0 %v1896_v3 }
 0x8b1   : > { %2666 = vmatpush3.bf16.msra.mxu0 %v3005_v5 }
 0x8b2   : > { %2667 = vmatprep.subr.bf16.mxu0 %v3006_v9 }
 0x8b5   : > { %2668 = vmatpush3.bf16.msra.mxu0 %v3007_v41 }
 0x8b6   : > { %2669 = vmatprep.subr.bf16.mxu0 %v3008_v63 }
 0x8b9   : > { %2670 = vmatpush3.bf16.msra.mxu0 %v3009_v40 }
 0x8ba   : > { %2671 = vmatprep.subr.bf16.mxu0 %v3010_v32 }
 0x8bd   : > { %2672 = vmatpush3.bf16.msra.mxu0 %v3011_v29 }
 0x8be   : > { %2673 = vmatprep.subr.bf16.mxu0 %v3012_v43 }
 0x8c1   : > { %2674 = vmatpush3.bf16.msra.mxu0 %v3013_v46 }
 0x8c2   : > { %2675 = vmatprep.subr.bf16.mxu0 %v3014_v11 }
 0x8c5   : > { %2676 = vmatpush3.bf16.msra.mxu0 %v3015_v50 }
 0x8c6   : > { %2677 = vmatprep.subr.bf16.mxu0 %v3016_v30 }
 0x8c9   : > { %2678 = vmatpush3.bf16.msra.mxu0 %v3017_v57 }
 0x8ca   : > { %2679 = vmatprep.subr.bf16.mxu0 %v3018_v60 }
 0x8cd   : > { %2680 = vmatpush3.bf16.msra.mxu0 %v3019_v0 }
 0x983   : > { %v2006_v4 = vpop.f32.mrb[28].mxu0 }
 0x984   : > { %v2007_v48 = vadd.f32 %v2558_v7, %v2006_v4  ;;  %v2821_v6 = vpop.f32.mrb[29].mxu0 }
 0x985   : > { %v2009_v8 = vpop.f32.mrb[30].mxu0 }
 0x986   : > { %v3737_v56 = vadd.f32 %v3090_v51, %v2007_v48  ;;  %v2822_v61 = vpop.f32.mrb[31].mxu0  ;;  %v2587_v48 = vld [vmem:[%s2217_s19] ss:$0 sm:$0xff] }
 0x988   : > { %2013 = vadd.xlane.f32.xlu0 %v3737_v56  ;;  %v2361_v61 = vmul.f32 2.0, %v3737_v56 }
 0xa15   : > { %v2014_v26 = vpop.xlane.xlu0 %2013 }
 0xa16   : > { %v2015_v27 = vmul.f32 0.0078125, %v2014_v26 }
 0xa18   : > { %v2016_v28 = vsub.f32 %v3737_v56, %v2015_v27  ;;  %v2605_v56 = vld [vmem:[%s3873_s12] ss:$0 sm:$0xff] (!%p2604_p0) }
 0xa1a   : > { %v2017_v31 = vmul.f32 %v2016_v28, %v2016_v28 }
 0xa1c   : > { %2018 = vadd.xlane.f32.xlu1 %v2017_v31 }
 0xaa9   : > { %v2019_v10 = vpop.xlane.xlu1 %2018 }
 0xaaa   : > { %v2020_v52 = vmul.f32 0.007874016, %v2019_v10 }
 0xaac   : > { %v2021_v23 = vadd.f32 1e-06, %v2020_v52 }
 0xaae   : > { %3088 = vrsqrt.f32 %v2021_v23 }
 0xab8   : > { %v3089_v53 = vpop.eup %3088 }
 0xab9   : > { %v2023_v54 = vmul.f32 %v3089_v53, %v2016_v28  ;;  %v2606_v28 = vld [vmem:[%s3874_s13] ss:$0 sm:$0xff] (!%p2604_p0) }
 0xabb   : > { %v2024_v55 = vpack.c.bf16 %v2023_v54, %v2023_v54 }
 0xabd   : > { %2171 = vmatmul.mubr.bf16.vlgmr.msra.gmra.mrb[44].mxu1 %v2024_v55 }
 0xb90   : > { %v2172_v44 = vpop.f32.mrb[44].mxu1 }
 0xb91   : > { %v2173_v49 = vadd.f32 %v2172_v44, %v2051_v16  ;;  %v2174_v45 = vpop.f32.mrb[45].mxu1 }
 0xb92   : > { %v2175_v34 = vadd.f32 %v2174_v45, %v2055_v12  ;;  %v2176_v47 = vpop.f32.mrb[46].mxu1 }
 0xb93   : > { %v2179_v1 = vmax.f32 %v2173_v49, 0.0  ;;  %v2177_v2 = vpop.f32.mrb[47].mxu1 }
 0xb94   : > { %v2180_v3 = vmax.f32 %v2175_v34, 0.0 }
 0xb95   : > { %v2181_v4 = vpack.c.bf16 %v2179_v1, %v2179_v1 }
 0xb96   : > { %v2182_v7 = vpack.c.bf16 %v2180_v3, %v2180_v3 }
 0xb98   : > { %2353 = vmatprep.mubr.bf16.mxu0 %v2182_v7 }
 0xb99   : > { %2354 = vmatmul.mubr.bf16.vlgmr.msra.gmra.mrb[32].mxu0 %v2181_v4 }
 0xc6c   : > { %v2681_v59 = vpop.f32.mrb[32].mxu0 }
 0xc6d   : > { %v2682_v58 = vpop.f32.mrb[33].mxu0 }
 0xc6e   : > { %v2683_v62 = vadd.f32 %v2682_v58, %v2681_v59  ;;  %v2684_v6 = vpop.f32.mrb[34].mxu0  ;;  %2367 = sbr.rel (%p2604_p0) target bundleno = 3498 (0xdaa), region = 84 }
 0xc6f   : > { %v2685_v8 = vpop.f32.mrb[35].mxu0 }
 0xc70   : > { %v2356_v51 = vadd.f32 %v2683_v62, %v2587_v48 }
 0xc72   : > { %v2362_v13 = vadd.f32 %v2361_v61, %v2356_v51 }
 0xc74   : > { %2363 = vst [vmem:[#allocation2] sm:$0xff] %v2362_v13  ;;  %2370 = vadd.xlane.f32.xlu0 (!%p2604_p0), %v2362_v13 }
 0xd01   : > { %v2371_v14 = vpop.xlane.xlu0 %2370 }
 0xd02   : > { %v2372_v17 = vmul.f32 0.0078125, %v2371_v14 }
 0xd04   : > { %v2373_v19 = vsub.f32 %v2362_v13, %v2372_v17 }
 0xd06   : > { %v2374_v20 = vmul.f32 %v2373_v19, %v2373_v19  ;;  %v2386_v26 = vmul.f32 %v2605_v56, %v2373_v19 }
 0xd08   : > { %2375 = vadd.xlane.f32.xlu0 %v2374_v20 }
 0xd95   : > { %v2376_v18 = vpop.xlane.xlu0 %2375 }
 0xd96   : > { %v2377_v22 = vmul.f32 0.007874016, %v2376_v18 }
 0xd98   : > { %v2378_v24 = vadd.f32 1e-06, %v2377_v22 }
 0xd9a   : > { %3091 = vrsqrt.f32 %v2378_v24 }
 0xda4   : > { %v3092_v27 = vpop.eup %3091 }
 0xda5   : > { %v2387_v31 = vmul.f32 %v3092_v27, %v2386_v26 }
 0xda7   : > { %v2394_v15 = vadd.f32 %v2606_v28, %v2387_v31 }
 0xda9   : > { %2395 = vst [vmem:[%s3898_s22] sm:$0xff] %v2394_v15 }
 0xdaa PF: > { %s2608_s27 = sshll.u32 %s3175_s17, 7  ;;  %s3899_s20 = scalar_lea.vmem [#allocation3], %s3349_s23 }
 0xdab   : > { %s3810_s29 = scalar_lea.hbm %s3875_s14, %s2608_s27  ;;  %s2410_s19 = sshll.u32 %s3899_s20, 4  ;;  %s2411_s19 = int_to_ptr.vmem [resolvable:$true] %s2410_s19 }
 0xdac   : > { %s3900_s24 = sand.u32 1, %s3163_s30   ;;  %s3093_s21 = scalar_lea.vmem %s2411_s19, 128 }
 0xdad   : > { %s2397_s26 = scalar_lea.sflag [#allocation4], %s3900_s24  ;;  %p3094_p1 = scmp.ne.s32.totalorder %s2411_s19, %s3093_s21 }
 0xdae   : > { %s3200_s16 = smov [#allocation3]  }
 0xdaf   : > { %p3095_p2 = pnand %p3094_p1, %p3325_p3  ;;  %s3097_s22 = sshll.u32 %s3200_s16, 4  ;;  %s3098_s22 = int_to_ptr.vmem [resolvable:$false] %s3097_s22 }
 0xdb0   : > { %s3099_s0 = scalar_lea.vmem %s3098_s22, 256  ;;  %p3100_p5 = scmp.lt.s32.totalorder %s2411_s19, %s3098_s22 }
 0xdb1   : > { %p3096_p4 = pneg %p3095_p2  ;;  %p3101_p6 = scmp.lt.s32.totalorder %s3099_s0, %s3093_s21 }
 0xdb3   : > { %p3102_p7 = por %p3101_p6, %p3100_p5 }
 0xdb5   : > { %p3103_p8 = pnand %p3102_p7, %p3096_p4 }
 0xdb7   : > { %3106 = shalt.err (!%p3103_p8)
}
 0xdb8   : > { %s3107_s17 = scalar_lea.hbm %s3810_s29, 128  ;;  %s3111_s28 = scalar_lea.hbm %s3875_s14, 256 }
 0xdb9   : > { %p3108_p10 = scmp.ne.s32.totalorder %s3810_s29, %s3107_s17  ;;  %p3112_p13 = scmp.lt.u32.totalorder %s3810_s29, %s3875_s14 }
 0xdba   : > { %p3113_p0 = scmp.lt.u32.totalorder %s3111_s28, %s3107_s17  ;;  %p3115_p2 = scmp.lt.u32.totalorder %s3107_s17, %s3810_s29 }
 0xdbb   : > { %p3109_p11 = pnand %p3108_p10, %p3325_p3 }
 0xdbc   : > { %p3114_p1 = por %p3113_p0, %p3112_p13 }
 0xdbd   : > { %p3110_p12 = pneg %p3109_p11 }
 0xdbe   : > { %p3116_p4 = por %p3115_p2, %p3114_p1 }
 0xdc0   : > { %p3117_p5 = pnand %p3116_p4, %p3110_p12 }
 0xdc2   : > { %3120 = shalt.err (!%p3117_p5)
}
 0xdc3   : > { %2823 = dma.vmem_to_hbm [thread:$0]  (%p3325_p3), %s2411_s19, 128, %s3810_s29, %s2397_s26  }
 0xdc4 PF: > { %s3901_s0 = sld [smem:[#allocation9_spill]]  ;;  %s3902_s24 = sld [smem:[#allocation6_spill]] }
 0xdca   : > { %p2829_p6 = scmp.ge.s32.totalorder %s3901_s0, 2  ;;  %s2422_s16 = sand.u32 1, %s3902_s24  }
 0xdcb   : > { %s2423_s22 = scalar_lea.sflag [#allocation4], %s2422_s16 }
 0xdcc   : > { %p2826_p7 = pnand %p2829_p6, %p3335_p9 }
 0xdce   : > { %3154 = dma.done.wait (!%p2826_p7), %s2423_s22, 128  }
 0xdcf   : > { %3156 = vsyncadd (!%p2826_p7), %s2423_s22, 4294967168  ;;  %s27_s20 = sadd.s32 1, %s3901_s0   ;;  %s3904_s17 = sld [smem:[#allocation13_spill]] }
 0xdd0   : > { %p24_p8 = scmp.ge.s32.totalorder %s27_s20, 6   ;;  %s3905_s16 = sld [smem:[#allocation7_spill]] }
 0xdd1   : > { %s3906_s25 = sld [smem:[#allocation8_spill]]  ;;  %s3907_s18 = sld [smem:[#allocation10_spill]] }
 0xdd2   : > { %s3908_s19 = sld [smem:[#allocation11_spill]]  ;;  %s3909_s29 = smov %s3163_s30 }
 0xdd3   : > { %s3910_s30 = smov %s3167_s15  ;;  %26 = sbr.rel (!%p24_p8) target bundleno = 7 (0x7), region = 132 }
 0xdd5   : > { %s3911_s15 = smov %s3904_s17 }
 0xdd7   : > { %s3912_s17 = smov %s3906_s25 }
 0xdda   :  { %2428 = vsyncpa [#allocation4], 1 }
 0xddb   :  { %2430 = vsyncpa [#allocation4 + $0x1], 1 }

</bundles_post_ra>
